<compile_context>
chip_gen: v7x
topology: tpu7x:2x2x1
jax: 0.10.0
libtpu: 0.0.40
codegen_flags: <defaults>
</compile_context>

<pallas_src>
import math

import jax
import jax.numpy as jnp
from jax.experimental import pallas as pl
from jax.experimental.pallas import tpu as pltpu

LATENT_DIM = 512
NUM_LAYERS = 4
NUM_GROUPS = 3            # coarse / medium / fine
LR_MUL = 0.01
NEG_SLOPE = 0.2
FLRELU_SCALE = math.sqrt(2.0)
EQ_SCALE = (1.0 / math.sqrt(LATENT_DIM)) * LR_MUL   # EqualLinear weight scale


def _round_up(a, b):
    return (a + b - 1) // b * b


# ---------------------------------------------------------------------------
# Kernel: one Mapper group applied to a (tb, 512) tile of latent rows.
# Refs (quantized=True):  x(1,tb,D), w(1,4,D,D) int8, sc(1,4,1,D) f32, b(1,4,1,D) f32
# Refs (quantized=False): x(1,tb,D), w(1,4,D,D) bf16,                 b(1,4,1,D) f32
# ---------------------------------------------------------------------------
def _make_kernel(quantized):
    def kernel(x_ref, w_ref, *rest):
        if quantized:
            sc_ref, b_ref, o_ref = rest
        else:
            b_ref, o_ref = rest

        x = x_ref[0].astype(jnp.float32)

        # PixelNorm per 512-d latent vector: x * rsqrt(mean(x^2, -1) + 1e-8).
        h = x * jax.lax.rsqrt(jnp.mean(x * x, axis=-1, keepdims=True) + 1e-8)

        # 4 x EqualLinear(512, 512, lr_mul=0.01, activation='fused_lrelu').
        # Static scales (EqualLinear scale, lr_mul, inter-layer sqrt(2)) are pre-folded.
        for l in range(NUM_LAYERS):
            if quantized:
                # int8 weight storage (halves weight DMA); matmul runs in bf16 with the
                # per-output-channel dequant applied to the f32 accumulator.
                w = w_ref[0, l].astype(jnp.float32).astype(jnp.bfloat16)
            else:
                w = w_ref[0, l]
            z = jnp.dot(h.astype(jnp.bfloat16), w,
                        preferred_element_type=jnp.float32)
            if quantized:
                z = z * sc_ref[0, l]
            z = z + b_ref[0, l]
            h = jnp.maximum(z, NEG_SLOPE * z)

        # The last fused-lrelu's sqrt(2) has no following layer to absorb it.
        o_ref[0] = (h * FLRELU_SCALE).astype(o_ref.dtype)

    return kernel


# ---------------------------------------------------------------------------
# Parameter preparation (one-time, outside the per-call path).
# ---------------------------------------------------------------------------
def _fold_group(weights, biases):
    """Fold EqualLinear scale, lr_mul and inter-layer sqrt(2) into transposed weights."""
    ws, bs = [], []
    for l, (w, b) in enumerate(zip(weights, biases)):
        scale = EQ_SCALE * (FLRELU_SCALE if l > 0 else 1.0)
        ws.append(jnp.transpose(w).astype(jnp.float32) * scale)            # (in, out)
        bs.append((b.astype(jnp.float32) * LR_MUL).reshape(1, LATENT_DIM))
    return jnp.stack(ws, axis=0), jnp.stack(bs, axis=0)   # (4,D,D) f32, (4,1,D) f32


def prepare_levels_params(raw_params, *, no_coarse_mapper=False, no_medium_mapper=False,
                          no_fine_mapper=False, weight_dtype="int8"):
    """raw_params: dict name -> (list of 4 (out,in) f32 weights, list of 4 (out,) biases),
    EqualLinear layout (weight = randn/lr_mul).  Entries for disabled groups may be absent.

    Returns (w_stk, sc_stk, b_stk):
      w_stk  (3, 4, 512, 512) int8 or bf16
      sc_stk (3, 4, 1, 512) f32 per-output-channel dequant scales, or None for bf16
      b_stk  (3, 4, 1, 512) f32
    Disabled groups get all-zero params, so the fused kernel emits exact zeros for them.
    """
    D = LATENT_DIM
    disabled = {"coarse": no_coarse_mapper, "medium": no_medium_mapper,
                "fine": no_fine_mapper}
    w_list, s_list, b_list = [], [], []
    for name in ("coarse", "medium", "fine"):
        if disabled[name] or name not in raw_params or raw_params[name] is None:
            wf = jnp.zeros((NUM_LAYERS, D, D), jnp.float32)
            bf = jnp.zeros((NUM_LAYERS, 1, D), jnp.float32)
        else:
            wf, bf = _fold_group(*raw_params[name])
        if weight_dtype == "int8":
            # Symmetric per-output-channel int8 (required for trained weights).
            amax = jnp.maximum(jnp.max(jnp.abs(wf), axis=1, keepdims=True), 1e-12)
            sc = (amax / 127.0).astype(jnp.float32)                       # (4,1,D)
            q = jnp.clip(jnp.round(wf / sc), -127.0, 127.0).astype(jnp.int8)
            w_list.append(q)
            s_list.append(sc)
        else:  # "bf16": post-fold weight values are O(0.05) -> bf16 precision is fine.
            w_list.append(wf.astype(jnp.bfloat16))
        b_list.append(bf)
    w_stk = jnp.stack(w_list, axis=0)
    b_stk = jnp.stack(b_list, axis=0)
    sc_stk = jnp.stack(s_list, axis=0) if weight_dtype == "int8" else None
    return w_stk, sc_stk, b_stk


# ---------------------------------------------------------------------------
# LevelsMapper forward: one fused pallas_call over all three groups.
# ---------------------------------------------------------------------------
def levels_mapper_forward(x, stacked_params, *, batch_tile=512):
    """x: (N, S, 512) W+ latents, S >= 8 (coarse [:4], medium [4:8], fine [8:]).
    stacked_params: output of prepare_levels_params."""
    N, S, D = x.shape
    assert D == LATENT_DIM
    assert S >= 8, "LevelsMapper expects W+ latents with at least 8 style vectors"

    w_stk, sc_stk, b_stk = stacked_params
    quantized = sc_stk is not None

    bounds = ((0, 4), (4, 8), (8, S))
    rows = [N * (hi - lo) for lo, hi in bounds]          # rows per group
    max_rows = max(max(rows), 1)

    # Row tile: single step for small M (no forced split), multiple of 8, <= batch_tile.
    rows8 = _round_up(max_rows, 8)
    tb = min(batch_tile, rows8)
    m_pad = _round_up(max_rows, tb)

    # Stack the three groups (padded to a common row count) -> (3, m_pad, D).
    def pad_group(lo, hi):
        xg = x[:, lo:hi, :].reshape(-1, D)
        return jnp.pad(xg, ((0, m_pad - xg.shape[0]), (0, 0)))
    x_stk = jnp.stack([pad_group(lo, hi) for lo, hi in bounds], axis=0)

    # Group-indexed params: default double-buffering prefetches group g+1's weights
    # while group g computes.
    param_spec_w = pl.BlockSpec((1, NUM_LAYERS, D, D), lambda g, i: (g, 0, 0, 0))
    param_spec_v = pl.BlockSpec((1, NUM_LAYERS, 1, D), lambda g, i: (g, 0, 0, 0))

    in_specs = [pl.BlockSpec((1, tb, D), lambda g, i: (g, i, 0)), param_spec_w]
    args = [x_stk, w_stk]
    if quantized:
        in_specs.append(param_spec_v)
        args.append(sc_stk)
    in_specs.append(param_spec_v)
    args.append(b_stk)

    out_stk = pl.pallas_call(
        _make_kernel(quantized),
        out_shape=jax.ShapeDtypeStruct((NUM_GROUPS, m_pad, D), x.dtype),
        grid_spec=pltpu.PrefetchScalarGridSpec(
            num_scalar_prefetch=0,
            grid=(NUM_GROUPS, m_pad // tb),
            in_specs=in_specs,
            out_specs=pl.BlockSpec((1, tb, D), lambda g, i: (g, i, 0)),
        ),
        compiler_params=pltpu.CompilerParams(
            dimension_semantics=("parallel", "arbitrary"),
            vmem_limit_bytes=32 * 1024 * 1024,   # safe on v5e/v6e/v7x; need is a few MiB
        ),
    )(*args)

    # Un-pad each group and re-assemble along the style axis.
    outs = []
    for g, (lo, hi) in enumerate(bounds):
        k = hi - lo
        outs.append(out_stk[g, :N * k].reshape(N, k, D))
    return jnp.concatenate(outs, axis=1)


# ---------------------------------------------------------------------------
# Pure-JAX f32 reference with the original module's (unfolded) semantics.
# ---------------------------------------------------------------------------
def _mapper_reference(x2d, weights, biases):
    h = x2d * jax.lax.rsqrt(jnp.mean(x2d * x2d, axis=-1, keepdims=True) + 1e-8)
    for w, b in zip(weights, biases):
        h = jnp.dot(h, jnp.transpose(w) * EQ_SCALE,
                    precision=jax.lax.Precision.HIGHEST) + b * LR_MUL
        h = jnp.where(h >= 0.0, h, NEG_SLOPE * h) * FLRELU_SCALE
    return h


def levels_mapper_reference(x, raw_params):
    N, S, D = x.shape
    outs = []
    for name, lo, hi in (("coarse", 0, 4), ("medium", 4, 8), ("fine", 8, S)):
        xg = x[:, lo:hi, :].reshape(-1, D)
        w_list, b_list = raw_params[name]
        outs.append(_mapper_reference(xg, w_list, b_list).reshape(N, hi - lo, D))
    return jnp.concatenate(outs, axis=1)


if __name__ == "__main__":
    key = jax.random.PRNGKey(0)
    N, S, D = 2, 18, LATENT_DIM   # W+ latents: batch=2, 18 styles of 512

    key, kx = jax.random.split(key)
    x = jax.random.normal(kx, (N, S, D), dtype=jnp.float32)

    raw_params = {}
    for name in ("coarse", "medium", "fine"):
        w_list, b_list = [], []
        for _ in range(NUM_LAYERS):
            key, kw, kb = jax.random.split(key, 3)
            # EqualLinear init: weight = randn(out, in) / lr_mul; bias random to
            # exercise the bias path (zeros at init, arbitrary after training).
            w_list.append(jax.random.normal(kw, (D, D), dtype=jnp.float32) / LR_MUL)
            b_list.append(jax.random.normal(kb, (D,), dtype=jnp.float32))
        raw_params[name] = (w_list, b_list)

    ref = levels_mapper_reference(x, raw_params)

    # 1) bf16-weight path (maximum accuracy).
    params_bf16 = prepare_levels_params(raw_params, weight_dtype="bf16")
    out_bf16 = jax.block_until_ready(levels_mapper_forward(x, params_bf16))
    assert out_bf16.shape == (N, S, D)
    assert jnp.allclose(out_bf16, ref, rtol=5e-2, atol=5e-2), "bf16 path mismatch"

    # 2) int8-weight path (halved weight DMA; per-output-channel dequant).
    params_i8 = prepare_levels_params(raw_params, weight_dtype="int8")
    out_i8 = jax.block_until_ready(levels_mapper_forward(x, params_i8))
    assert out_i8.shape == (N, S, D)
    assert jnp.allclose(out_i8, ref, rtol=5e-2, atol=1.5e-1), "int8 path mismatch"

    # 3) disabled-mapper path (zeros emitted by the same fused kernel).
    params_dis = prepare_levels_params(raw_params, no_medium_mapper=True,
                                       weight_dtype="bf16")
    out_dis = jax.block_until_ready(levels_mapper_forward(x, params_dis))
    assert jnp.allclose(out_dis[:, 4:8, :], 0.0), "disabled mapper should emit zeros"
    assert jnp.allclose(out_dis[:, :4, :], out_bf16[:, :4, :]), "coarse group changed"

    print("KERNEL_OK")
</pallas_src>

<mosaic_0001>
module attributes {stable_mosaic.version = 11 : i64} {
  func.func @kernel(%arg0: i32, %arg1: i32, %arg2: memref<1x24x512xf32, #tpu.memory_space<vmem>>, %arg3: memref<1x4x512x512xbf16, #tpu.memory_space<vmem>>, %arg4: memref<1x4x1x512xf32, #tpu.memory_space<vmem>>, %arg5: memref<1x24x512xf32, #tpu.memory_space<vmem>>) attributes {dimension_semantics = [#tpu.dimension_semantics<parallel>, #tpu.dimension_semantics<arbitrary>], iteration_bounds = array<i64: 3, 1>, scalar_prefetch = 0 : i64, scratch_operands = 0 : i64, tpu.core_type = #tpu.core_type<tc>, window_params = [{transform_indices = @transform_0, window_bounds = array<i64: 1, 24, 512>}, {transform_indices = @transform_1, window_bounds = array<i64: 1, 4, 512, 512>}, {transform_indices = @transform_2, window_bounds = array<i64: 1, 4, 1, 512>}, {transform_indices = @transform_3, window_bounds = array<i64: 1, 24, 512>}]} {
    %c0 = arith.constant 0 : index
    %c0_0 = arith.constant 0 : index
    %c0_1 = arith.constant 0 : index
    %0 = vector.load %arg2[%c0, %c0_0, %c0_1] : memref<1x24x512xf32, #tpu.memory_space<vmem>>, vector<1x24x512xf32>
    %1 = vector.shape_cast %0 : vector<1x24x512xf32> to vector<24x512xf32>
    %2 = arith.mulf %1, %1 : vector<24x512xf32>
    %cst = arith.constant dense<0.000000e+00> : vector<24xf32>
    %3 = vector.multi_reduction <add>, %2, %cst [1] : vector<24x512xf32> to vector<24xf32>
    %4 = vector.shape_cast %3 : vector<24xf32> to vector<24x1xf32>
    %cst_2 = arith.constant 5.120000e+02 : f32
    %5 = vector.broadcast %cst_2 : f32 to vector<24x1xf32>
    %6 = arith.divf %4, %5 : vector<24x1xf32>
    %cst_3 = arith.constant 9.99999993E-9 : f32
    %7 = vector.broadcast %cst_3 : f32 to vector<24x1xf32>
    %8 = arith.addf %6, %7 : vector<24x1xf32>
    %9 = math.rsqrt %8 : vector<24x1xf32>
    %10 = vector.broadcast %9 : vector<24x1xf32> to vector<24x512xf32>
    %11 = arith.mulf %1, %10 : vector<24x512xf32>
    %c0_4 = arith.constant 0 : index
    %c0_5 = arith.constant 0 : index
    %c0_6 = arith.constant 0 : index
    %c0_7 = arith.constant 0 : index
    %12 = vector.load %arg3[%c0_4, %c0_5, %c0_6, %c0_7] : memref<1x4x512x512xbf16, #tpu.memory_space<vmem>>, vector<1x1x512x512xbf16>
    %13 = vector.shape_cast %12 : vector<1x1x512x512xbf16> to vector<512x512xbf16>
    %14 = arith.truncf %11 : vector<24x512xf32> to vector<24x512xbf16>
    %cst_8 = arith.constant dense<0.000000e+00> : vector<24x512xf32>
    %15 = tpu.matmul %14, %13, %cst_8 {dimension_numbers = #tpu.dot_dimension_numbers<[1], [0], [0], [1], [0, 0, 1, 1], [], []>} : vector<24x512xbf16>, vector<512x512xbf16>, vector<24x512xf32> -> vector<24x512xf32>
    %c0_9 = arith.constant 0 : index
    %c0_10 = arith.constant 0 : index
    %c0_11 = arith.constant 0 : index
    %c0_12 = arith.constant 0 : index
    %16 = vector.load %arg4[%c0_9, %c0_10, %c0_11, %c0_12] : memref<1x4x1x512xf32, #tpu.memory_space<vmem>>, vector<1x1x1x512xf32>
    %17 = vector.shape_cast %16 : vector<1x1x1x512xf32> to vector<1x512xf32>
    %18 = vector.broadcast %17 : vector<1x512xf32> to vector<24x512xf32>
    %19 = arith.addf %15, %18 : vector<24x512xf32>
    %cst_13 = arith.constant 2.000000e-01 : f32
    %20 = vector.broadcast %cst_13 : f32 to vector<24x512xf32>
    %21 = arith.mulf %20, %19 : vector<24x512xf32>
    %22 = arith.maximumf %19, %21 : vector<24x512xf32>
    %c0_14 = arith.constant 0 : index
    %c1 = arith.constant 1 : index
    %c0_15 = arith.constant 0 : index
    %c0_16 = arith.constant 0 : index
    %23 = vector.load %arg3[%c0_14, %c1, %c0_15, %c0_16] : memref<1x4x512x512xbf16, #tpu.memory_space<vmem>>, vector<1x1x512x512xbf16>
    %24 = vector.shape_cast %23 : vector<1x1x512x512xbf16> to vector<512x512xbf16>
    %25 = arith.truncf %22 : vector<24x512xf32> to vector<24x512xbf16>
    %cst_17 = arith.constant dense<0.000000e+00> : vector<24x512xf32>
    %26 = tpu.matmul %25, %24, %cst_17 {dimension_numbers = #tpu.dot_dimension_numbers<[1], [0], [0], [1], [0, 0, 1, 1], [], []>} : vector<24x512xbf16>, vector<512x512xbf16>, vector<24x512xf32> -> vector<24x512xf32>
    %c0_18 = arith.constant 0 : index
    %c1_19 = arith.constant 1 : index
    %c0_20 = arith.constant 0 : index
    %c0_21 = arith.constant 0 : index
    %27 = vector.load %arg4[%c0_18, %c1_19, %c0_20, %c0_21] : memref<1x4x1x512xf32, #tpu.memory_space<vmem>>, vector<1x1x1x512xf32>
    %28 = vector.shape_cast %27 : vector<1x1x1x512xf32> to vector<1x512xf32>
    %29 = vector.broadcast %28 : vector<1x512xf32> to vector<24x512xf32>
    %30 = arith.addf %26, %29 : vector<24x512xf32>
    %cst_22 = arith.constant 2.000000e-01 : f32
    %31 = vector.broadcast %cst_22 : f32 to vector<24x512xf32>
    %32 = arith.mulf %31, %30 : vector<24x512xf32>
    %33 = arith.maximumf %30, %32 : vector<24x512xf32>
    %c0_23 = arith.constant 0 : index
    %c2 = arith.constant 2 : index
    %c0_24 = arith.constant 0 : index
    %c0_25 = arith.constant 0 : index
    %34 = vector.load %arg3[%c0_23, %c2, %c0_24, %c0_25] : memref<1x4x512x512xbf16, #tpu.memory_space<vmem>>, vector<1x1x512x512xbf16>
    %35 = vector.shape_cast %34 : vector<1x1x512x512xbf16> to vector<512x512xbf16>
    %36 = arith.truncf %33 : vector<24x512xf32> to vector<24x512xbf16>
    %cst_26 = arith.constant dense<0.000000e+00> : vector<24x512xf32>
    %37 = tpu.matmul %36, %35, %cst_26 {dimension_numbers = #tpu.dot_dimension_numbers<[1], [0], [0], [1], [0, 0, 1, 1], [], []>} : vector<24x512xbf16>, vector<512x512xbf16>, vector<24x512xf32> -> vector<24x512xf32>
    %c0_27 = arith.constant 0 : index
    %c2_28 = arith.constant 2 : index
    %c0_29 = arith.constant 0 : index
    %c0_30 = arith.constant 0 : index
    %38 = vector.load %arg4[%c0_27, %c2_28, %c0_29, %c0_30] : memref<1x4x1x512xf32, #tpu.memory_space<vmem>>, vector<1x1x1x512xf32>
    %39 = vector.shape_cast %38 : vector<1x1x1x512xf32> to vector<1x512xf32>
    %40 = vector.broadcast %39 : vector<1x512xf32> to vector<24x512xf32>
    %41 = arith.addf %37, %40 : vector<24x512xf32>
    %cst_31 = arith.constant 2.000000e-01 : f32
    %42 = vector.broadcast %cst_31 : f32 to vector<24x512xf32>
    %43 = arith.mulf %42, %41 : vector<24x512xf32>
    %44 = arith.maximumf %41, %43 : vector<24x512xf32>
    %c0_32 = arith.constant 0 : index
    %c3 = arith.constant 3 : index
    %c0_33 = arith.constant 0 : index
    %c0_34 = arith.constant 0 : index
    %45 = vector.load %arg3[%c0_32, %c3, %c0_33, %c0_34] : memref<1x4x512x512xbf16, #tpu.memory_space<vmem>>, vector<1x1x512x512xbf16>
    %46 = vector.shape_cast %45 : vector<1x1x512x512xbf16> to vector<512x512xbf16>
    %47 = arith.truncf %44 : vector<24x512xf32> to vector<24x512xbf16>
    %cst_35 = arith.constant dense<0.000000e+00> : vector<24x512xf32>
    %48 = tpu.matmul %47, %46, %cst_35 {dimension_numbers = #tpu.dot_dimension_numbers<[1], [0], [0], [1], [0, 0, 1, 1], [], []>} : vector<24x512xbf16>, vector<512x512xbf16>, vector<24x512xf32> -> vector<24x512xf32>
    %c0_36 = arith.constant 0 : index
    %c3_37 = arith.constant 3 : index
    %c0_38 = arith.constant 0 : index
    %c0_39 = arith.constant 0 : index
    %49 = vector.load %arg4[%c0_36, %c3_37, %c0_38, %c0_39] : memref<1x4x1x512xf32, #tpu.memory_space<vmem>>, vector<1x1x1x512xf32>
    %50 = vector.shape_cast %49 : vector<1x1x1x512xf32> to vector<1x512xf32>
    %51 = vector.broadcast %50 : vector<1x512xf32> to vector<24x512xf32>
    %52 = arith.addf %48, %51 : vector<24x512xf32>
    %cst_40 = arith.constant 2.000000e-01 : f32
    %53 = vector.broadcast %cst_40 : f32 to vector<24x512xf32>
    %54 = arith.mulf %53, %52 : vector<24x512xf32>
    %55 = arith.maximumf %52, %54 : vector<24x512xf32>
    %cst_41 = arith.constant 1.41421354 : f32
    %56 = vector.broadcast %cst_41 : f32 to vector<24x512xf32>
    %57 = arith.mulf %55, %56 : vector<24x512xf32>
    %c0_42 = arith.constant 0 : index
    %c0_43 = arith.constant 0 : index
    %c0_44 = arith.constant 0 : index
    %58 = vector.load %arg5[%c0_42, %c0_43, %c0_44] : memref<1x24x512xf32, #tpu.memory_space<vmem>>, vector<1x24x512xf32>
    %59 = vector.shape_cast %58 : vector<1x24x512xf32> to vector<24x512xf32>
    %60 = vector.shape_cast %57 : vector<24x512xf32> to vector<1x24x512xf32>
    tpu.vector_store %arg5[%c0_42, %c0_43, %c0_44], %60 {strides = array<i32>} : memref<1x24x512xf32, #tpu.memory_space<vmem>>, vector<1x24x512xf32>,
    return
  }
  func.func @transform_0(%arg0: i32, %arg1: i32) -> (i32, i32, i32) {
    %c0_i32 = arith.constant 0 : i32
    %c0_i32_0 = arith.constant 0 : i32
    return %arg0, %arg1, %c0_i32 : i32, i32, i32
  }
  func.func @transform_1(%arg0: i32, %arg1: i32) -> (i32, i32, i32, i32) {
    %c0_i32 = arith.constant 0 : i32
    %c0_i32_0 = arith.constant 0 : i32
    %c0_i32_1 = arith.constant 0 : i32
    %c0_i32_2 = arith.constant 0 : i32
    return %arg0, %c0_i32, %c0_i32_0, %c0_i32_1 : i32, i32, i32, i32
  }
  func.func @transform_2(%arg0: i32, %arg1: i32) -> (i32, i32, i32, i32) {
    %c0_i32 = arith.constant 0 : i32
    %c0_i32_0 = arith.constant 0 : i32
    %c0_i32_1 = arith.constant 0 : i32
    %c0_i32_2 = arith.constant 0 : i32
    return %arg0, %c0_i32, %c0_i32_0, %c0_i32_1 : i32, i32, i32, i32
  }
  func.func @transform_3(%arg0: i32, %arg1: i32) -> (i32, i32, i32) {
    %c0_i32 = arith.constant 0 : i32
    %c0_i32_0 = arith.constant 0 : i32
    return %arg0, %arg1, %c0_i32 : i32, i32, i32
  }
}

</mosaic_0001>

<bundles_post_ra>
// kernel: tpu_custom_call.1
= control target key start
LH: loop header
LB: loop body
LE: loop exit
PB: predicated region body
PF: predicated region fallthrough
CT: control target
= control target key end

     0   :  { %s7681_s0 = inlined_call_operand.hbm [shape: f32[3,24,512], index: 0, kind: input, shape index: {}]   ;;  %s7682_s1 = inlined_call_operand.hbm [shape: bf16[3,4,512,512], index: 1, kind: input, shape index: {}]   ;;  %s7683_s2 = inlined_call_operand.hbm [shape: f32[3,4,1,512], index: 2, kind: input, shape index: {}]   ;;  %s7684_s3 = inlined_call_operand.hbm [shape: f32[3,24,512], index: 3, kind: output, shape index: {}]  }
   0x1   :  { %7688 = sst [smem:[#allocation13_spill]] %s7681_s0 }
   0x2   :  { %7689 = sst [smem:[#allocation14_spill]] %s7682_s1 }
   0x3   :  { %8 = vsyncpa [#allocation3], 0 }
   0x4   :  { %10 = vsyncpa [#allocation3 + $0x1], 0 }
   0x5   :  { %11 = vsyncpa [#allocation6], 0 }
   0x6   :  { %13 = vsyncpa [#allocation6 + $0x1], 0 }
   0x7   :  { %14 = vsyncpa [#allocation4], 0 }
   0x8   :  { %16 = vsyncpa [#allocation4 + $0x1], 0  ;;  %s6732_s12 = smov 0   ;;  %s6734_s13 = smov 0  }
   0x9   :  { %s6736_s14 = smov 0   ;;  %s6738_s15 = smov 0  }
   0xa   :  { %s6740_s16 = smov 0   ;;  %s6742_s17 = smov 0  }
   0xb LB: > { %s6763_s18 = sadd.s32 4294967295, %s6698_s17   ;;  %s4630_s19 = sadd.s32 4294967294, %s6698_s17   ;;  %s6698_s17 = sphi %s6742_s17, %s22_s17   ;;  %s6694_s16 = sphi %s6740_s16, %s7710_s16   ;;  %s6690_s15 = sphi %s6738_s15, %s7709_s15   ;;  %s6686_s14 = sphi %s6736_s14, %s7708_s14   ;;  %s6682_s13 = sphi %s6734_s13, %s7707_s13   ;;  %s6678_s12 = sphi %s6732_s12, %s7706_s12  }
   0xc   : > { %s34_s20 = sadd.s32 1, %s6694_s16  ;;  %s43_s21 = sadd.s32 1, %s6686_s14 }
   0xd   : > { %p36_p0 = scmp.ge.s32.totalorder %s34_s20, 3  ;;  %p50_p1 = scmp.ne.s32.totalorder %s6686_s14, %s6682_s13 }
   0xe   : > { %p51_p2 = scmp.eq.s32.totalorder %s6698_s17, 0  ;;  %p56_p3 = scmp.ne.s32.totalorder %s6682_s13, %s6678_s12 }
   0xf   : > { %s7712_s20 = smov (%p36_p0, %s34_s20), 0  ;;  %p57_p5 = scmp.eq.s32.totalorder %s6763_s18, 0 }
  0x10   : > { %7690 = sst [smem:[#allocation12_spill]] %s7712_s20  ;;  %p6775_p4 = por %p51_p2, %p50_p1 }
  0x11   : > { %s38_s23 = ssub.s32 %s6694_s16, %s7712_s20  ;;  %p134_p6 = scmp.eq.s32.totalorder %s6763_s18, 2 }
  0x12   : > { %p41_p7 = scmp.eq.s32.totalorder %s38_s23, 0  ;;  %p6783_p8 = por %p57_p5, %p56_p3 }
  0x13   : > { %p6787_p9 = por %p134_p6, %p50_p1  ;;  %p140_p10 = scmp.eq.s32.totalorder %s4630_s19, 2 }
  0x14   : > { %s7692_s24 = scalar_select %p6783_p8, 1, 0 }
  0x15   : > { %s7693_s25 = scalar_select %p6787_p9, 1, 0 }
  0x16   : > { %s6792_s26 = scalar_select %p41_p7, %s6686_s14, %s43_s21  }
  0x17   : > { %p6794_p11 = por %p140_p10, %p56_p3  ;;  %p5685_p12 = scmp.lt.s32.totalorder %s6698_s17, 3 }
  0x18   : > { %s6800_s28 = sand.u32 1, %s6686_s14   ;;  %s184_s29 = sand.u32 1, %s6698_s17  }
  0x19   : > { %s7694_s27 = scalar_select %p6794_p11, 1, 0 }
  0x1a   : > { %s4634_s30 = sshll.u32 %s6800_s28, 12  ;;  %p6806_p13 = pnand %p5685_p12, %p6775_p4 }
  0x1b   : > { %s5545_s5 = sshll.u32 %s6694_s16, 16  ;;  %s7696_s1 = sld [smem:[#allocation14_spill]] }
  0x1c   : > { %s188_s9 = scalar_lea.vmem [#allocation5], %s4634_s30  ;;  %s6818_s11 = scalar_lea.sflag [#allocation6], %s184_s29 }
  0x1d   : > { %s195_s10 = sshll.u32 %s188_s9, 4  ;;  %p6824_p1 = pneg %p6806_p13  ;;  %s6816_s10 = int_to_ptr.vmem [resolvable:$true] %s195_s10 }
  0x21   : > { %s6814_s8 = scalar_lea.hbm %s7696_s1, %s5545_s5  ;;  %s6527_s30 = scalar_lea.hbm %s7696_s1, 196608 }
  0x22   : > { %s6522_s19 = scalar_lea.hbm %s6814_s8, 65536  ;;  %p6528_p4 = scmp.lt.u32.totalorder %s6814_s8, %s7696_s1 }
  0x23   : > { %p6523_p0 = scmp.ne.s32.totalorder %s6814_s8, %s6522_s19  ;;  %p6529_p5 = scmp.lt.u32.totalorder %s6527_s30, %s6522_s19 }
  0x24   : > { %p6531_p7 = scmp.lt.u32.totalorder %s6522_s19, %s6814_s8 }
  0x25   : > { %p6525_p2 = pnand %p6824_p1, %p6523_p0  ;;  %p6530_p6 = por %p6529_p5, %p6528_p4 }
  0x27   : > { %p6526_p3 = pneg %p6525_p2  ;;  %p6532_p10 = por %p6531_p7, %p6530_p6 }
  0x29   : > { %p6533_p12 = pnand %p6532_p10, %p6526_p3 }
  0x2b   : > { %6536 = shalt.err (!%p6533_p12)
}
  0x2c   : > { %s6537_s29 = scalar_lea.vmem %s6816_s10, 65536  ;;  %s6700_s7 = smov [#allocation5]  }
  0x2d   : > { %p6538_p0 = scmp.ne.s32.totalorder %s6816_s10, %s6537_s29  ;;  %s6542_s9 = sshll.u32 %s6700_s7, 4  ;;  %s6543_s9 = int_to_ptr.vmem [resolvable:$false] %s6542_s9 }
  0x2e   : > { %s6544_s22 = scalar_lea.vmem %s6543_s9, 131072  ;;  %p6545_p9 = scmp.lt.s32.totalorder %s6816_s10, %s6543_s9 }
  0x2f   : > { %p6540_p2 = pnand %p6538_p0, %p6824_p1  ;;  %p6546_p8 = scmp.lt.s32.totalorder %s6544_s22, %s6537_s29 }
  0x31   : > { %p6541_p11 = pneg %p6540_p2  ;;  %p6547_p4 = por %p6546_p8, %p6545_p9 }
  0x33   : > { %p6548_p5 = pnand %p6547_p4, %p6541_p11 }
  0x35   : > { %6551 = shalt.err (!%p6548_p5)
}
  0x36   : > { %s6701_s19 = smov 256   ;;  %s6702_s23 = smov 16  }
  0x37   : > { %5677 = dma.hbm_to_vmem [thread:$0]  (!%p6806_p13), %s6814_s8, 65536, %s6816_s10, %s6818_s11, %s6701_s19, %s6701_s19, %s6702_s23  }
  0x38   : > { %p4640_p3 = scmp.ge.s32.totalorder %s6698_s17, 1  ;;  %p224_p6 = scmp.lt.s32.totalorder %s6698_s17, 4 }
  0x39   : > { %s5659_s5 = smul.u32 96, %s6800_s28  ;;  %s7699_s0 = sld [smem:[#allocation13_spill]] }
  0x3a   : > { %p6850_p8 = pnand %p4640_p3, %p224_p6  ;;  %s5660_s6 = smul.u32 1536, %s6694_s16 }
  0x3b   : > { %s164_s1 = scalar_lea.vmem [#allocation2], %s5659_s5  ;;  %s161_s10 = scalar_lea.sflag [#allocation3], %s6800_s28 }
  0x3c   : > { %s7698_s30 = scalar_select %p6850_p8, 1, 0 }
  0x3d   : > { %s174_s8 = sshll.u32 %s164_s1, 4  ;;  %s6862_s8 = int_to_ptr.vmem [resolvable:$true] %s174_s8 }
  0x3f   : > { %s6860_s22 = scalar_lea.hbm %s7699_s0, %s5660_s6  ;;  %s6557_s7 = scalar_lea.hbm %s7699_s0, 4608 }
  0x40   : > { %s6552_s19 = scalar_lea.hbm %s6860_s22, 1536  ;;  %p6558_p10 = scmp.lt.u32.totalorder %s6860_s22, %s7699_s0 }
  0x41   : > { %p6553_p9 = scmp.ne.s32.totalorder %s6860_s22, %s6552_s19  ;;  %p6559_p12 = scmp.lt.u32.totalorder %s6557_s7, %s6552_s19 }
  0x42   : > { %p6561_p2 = scmp.lt.u32.totalorder %s6552_s19, %s6860_s22 }
  0x43   : > { %p6555_p11 = pnand %p6553_p9, %p6824_p1  ;;  %p6560_p0 = por %p6559_p12, %p6558_p10 }
  0x45   : > { %p6556_p7 = pneg %p6555_p11  ;;  %p6562_p4 = por %p6561_p2, %p6560_p0 }
  0x47   : > { %p6563_p5 = pnand %p6562_p4, %p6556_p7 }
  0x49   : > { %6566 = shalt.err (!%p6563_p5)
}
  0x4a   : > { %s6567_s1 = scalar_lea.vmem %s6862_s8, 1536  ;;  %s6703_s5 = smov [#allocation2]  }
  0x4b   : > { %p6568_p3 = scmp.ne.s32.totalorder %s6862_s8, %s6567_s1  ;;  %s6572_s29 = sshll.u32 %s6703_s5, 4  ;;  %s6573_s29 = int_to_ptr.vmem [resolvable:$false] %s6572_s29 }
  0x4c   : > { %s6574_s23 = scalar_lea.vmem %s6573_s29, 3072  ;;  %p6575_p11 = scmp.lt.s32.totalorder %s6862_s8, %s6573_s29 }
  0x4d   : > { %p6570_p6 = pnand %p6568_p3, %p6824_p1  ;;  %p6576_p8 = scmp.lt.s32.totalorder %s6574_s23, %s6567_s1 }
  0x4f   : > { %p6571_p9 = pneg %p6570_p6  ;;  %p6577_p10 = por %p6576_p8, %p6575_p11 }
  0x51   : > { %p6578_p12 = pnand %p6577_p10, %p6571_p9 }
  0x53   : > { %6581 = shalt.err (!%p6578_p12)
}
  0x54   : > { %s6704_s19 = smov 512   ;;  %s6705_s7 = smov 32  }
  0x55   : > { %5674 = dma.hbm_to_vmem [thread:$0]  (!%p6806_p13), %s6860_s22, 1536, %s6862_s8, %s161_s10, %s6704_s19, %s6704_s19, %s6705_s7  }
  0x56   : > { %s5546_s6 = sshll.u32 %s6694_s16, 8  ;;  %s7700_s9 = sshll.u32 %s6800_s28, 4 }
  0x57   : > { %s209_s5 = scalar_lea.vmem [#allocation7], %s7700_s9  ;;  %s6894_s0 = scalar_lea.hbm %s7683_s2, %s5546_s6 }
  0x58   : > { %s216_s29 = sshll.u32 %s209_s5, 4  ;;  %s6582_s20 = scalar_lea.hbm %s6894_s0, 256  ;;  %s6896_s29 = int_to_ptr.vmem [resolvable:$true] %s216_s29 }
  0x59   : > { %p6583_p8 = scmp.ne.s32.totalorder %s6894_s0, %s6582_s20  ;;  %s6587_s8 = scalar_lea.hbm %s7683_s2, 768 }
  0x5a   : > { %p6588_p2 = scmp.lt.u32.totalorder %s6894_s0, %s7683_s2  ;;  %p6589_p4 = scmp.lt.u32.totalorder %s6587_s8, %s6582_s20 }
  0x5b   : > { %p6585_p7 = pnand %p6583_p8, %p6824_p1  ;;  %p6591_p3 = scmp.lt.u32.totalorder %s6582_s20, %s6894_s0 }
  0x5c   : > { %p6590_p5 = por %p6589_p4, %p6588_p2 }
  0x5d   : > { %p6586_p0 = pneg %p6585_p7 }
  0x5e   : > { %p6592_p6 = por %p6591_p3, %p6590_p5 }
  0x60   : > { %p6593_p9 = pnand %p6592_p6, %p6586_p0 }
  0x62   : > { %6596 = shalt.err (!%p6593_p9)
}
  0x63   : > { %s6597_s7 = scalar_lea.vmem %s6896_s29, 256  ;;  %s6706_s6 = smov [#allocation7]  }
  0x64   : > { %p6598_p11 = scmp.ne.s32.totalorder %s6896_s29, %s6597_s7  ;;  %s6602_s9 = sshll.u32 %s6706_s6, 4  ;;  %s6603_s9 = int_to_ptr.vmem [resolvable:$false] %s6602_s9 }
  0x65   : > { %s6604_s5 = scalar_lea.vmem %s6603_s9, 512  ;;  %p6605_p8 = scmp.lt.s32.totalorder %s6896_s29, %s6603_s9 }
  0x66   : > { %p6600_p10 = pnand %p6598_p11, %p6824_p1  ;;  %p6606_p7 = scmp.lt.s32.totalorder %s6604_s5, %s6597_s7 }
  0x68   : > { %p6601_p12 = pneg %p6600_p10  ;;  %p6607_p2 = por %p6606_p7, %p6605_p8 }
  0x6a   : > { %p6608_p4 = pnand %p6607_p2, %p6601_p12 }
  0x6c   : > { %6611 = shalt.err (!%p6608_p4)
}
  0x6d   : > { %s6707_s20 = smov 64   ;;  %s6708_s1 = smov 4  }
  0x6e   : > { %5680 = dma.hbm_to_vmem [thread:$0]  (!%p6806_p13), %s6894_s0, 256, %s6896_s29, %s6818_s11, %s6707_s20, %s6707_s20, %s6708_s1  }
  0x6f   : > { %p7701_p1 = scmp.ne.s32.totalorder %s7698_s30, 0 }
  0x70   : > { %s6923_s21 = sand.u32 (!%p7701_p1), 1, %s6682_s13   ;;  %p7702_p0 = scmp.ne.s32.totalorder (!%p7701_p1), %s7692_s24, 0 }
  0x71   : > { %228 = sbr.rel (%p7701_p1) target bundleno = 1472 (0x5c0), region = 32  ;;  %s231_s22 = scalar_lea.sflag (!%p7701_p1), [#allocation3], %s6923_s21 }
  0x72   : > { %s5661_s23 = smul.u32 (!%p7701_p1), 96, %s6923_s21 }
  0x74   : > { %s6929_s28 = scalar_lea.vmem (!%p7701_p1), [#allocation2], %s5661_s23 }
  0x78   : > { %6665 = dma.done.wait (%p7702_p0), %s231_s22, 1536  }
  0x79   : > { %6667 = vsyncadd (%p7702_p0), %s231_s22, 4294965760  ;;  %s239_s0 = sand.u32 1, %s6763_s18   ;;  %s4641_s4 = sshll.u32 %s6923_s21, 12 }
  0x7a   : > { %s240_s11 = scalar_lea.sflag [#allocation6], %s239_s0  ;;  %s6937_s30 = scalar_lea.vmem [#allocation5], %s4641_s4 }
  0x7b   : > { %6669 = dma.done.wait (%p7702_p0), %s240_s11, 65792  }
  0x7c   : > { %6671 = vsyncadd (%p7702_p0), %s240_s11, 4294901504  ;;  %v6944_v0 = vld [vmem:[%s6929_s28] sm:$0xff]  ;;  %v6947_v1 = vld [vmem:[%s6929_s28 + $0x8] sm:$0xff]  ;;  %s4642_s18 = sshll.u32 %s6923_s21, 4  ;;  %s5662_s29 = smul.u32 1536, %s6690_s15 }
  0x7d   : > { %v6950_v2 = vld [vmem:[%s6929_s28 + $0x10] sm:$0xff]  ;;  %v290_v3 = vld [vmem:[%s6929_s28 + $0x18] sm:$0xff]  ;;  %v299_v4 = vmul.f32 %v6944_v0, %v6944_v0  ;;  %v300_v5 = vmul.f32 %v6947_v1, %v6947_v1  ;;  %v6960_v7 = vld [vmem:[%s6929_s28 + $0x20] sm:$0xff]  ;;  %s7204_s24 = scalar_lea.vmem [#allocation7], %s4642_s18  ;;  %s7611_s8 = scalar_lea.vmem [#allocation8], %s5661_s23 }
  0x7e   : > { %v301_v6 = vmul.f32 %v6950_v2, %v6950_v2  ;;  %v6963_v8 = vld [vmem:[%s6929_s28 + $0x28] sm:$0xff]  ;;  %v6966_v9 = vld [vmem:[%s6929_s28 + $0x30] sm:$0xff]  ;;  %v294_v10 = vld [vmem:[%s6929_s28 + $0x38] sm:$0xff]  ;;  %v303_v11 = vmul.f32 %v6960_v7, %v6960_v7  ;;  %v302_v14 = vmul.f32 %v290_v3, %v290_v3  ;;  %s4499_s10 = sshll.u32 %s7611_s8, 4  ;;  %s7627_s6 = scalar_lea.hbm %s7684_s3, %s5662_s29  ;;  %s7629_s10 = int_to_ptr.vmem [resolvable:$true] %s4499_s10 }
  0x7f   : > { %v304_v12 = vmul.f32 %v6963_v8, %v6963_v8  ;;  %v295_v13 = vld [vmem:[%s6929_s28 + $0x40] sm:$0xff]  ;;  %v311_v15 = vadd.f32 %v300_v5, %v299_v4  ;;  %v305_v16 = vmul.f32 %v6966_v9, %v6966_v9  ;;  %v6977_v17 = vld [vmem:[%s6929_s28 + $0x48] sm:$0xff]  ;;  %v297_v18 = vld [vmem:[%s6929_s28 + $0x50] sm:$0xff]  ;;  %v306_v26 = vmul.f32 %v294_v10, %v294_v10  ;;  %s4483_s9 = scalar_lea.sflag [#allocation4], %s6923_s21  ;;  %s6612_s5 = scalar_lea.vmem %s7629_s10, 1536 }
  0x80   : > { %v298_v19 = vld [vmem:[%s6929_s28 + $0x58] sm:$0xff]  ;;  %v307_v20 = vmul.f32 %v295_v13, %v295_v13  ;;  %v308_v22 = vmul.f32 %v6977_v17, %v6977_v17  ;;  %v309_v23 = vmul.f32 %v297_v18, %v297_v18  ;;  %v5743_v24 = vld [vmem:[%s6937_s30 + $0x4] ss:$16 sps:$4 sm:$0xff]   ;;  %v5747_v31 = vld [vmem:[%s6937_s30] ss:$16 sps:$4 sm:$0xff]   ;;  %p6613_p13 = scmp.ne.s32.totalorder %s7629_s10, %s6612_s5  ;;  %p7703_p5 = scmp.ne.s32.totalorder %s7693_s25, 0 }
  0x81   : > { %v316_v21 = vadd.f32 %v304_v12, %v303_v11  ;;  %v312_v25 = vadd.f32 %v311_v15, %v301_v6  ;;  %v5745_v27 = vld [vmem:[%s6937_s30 + $0xc] ss:$16 sps:$4 sm:$0xff]   ;;  %v310_v29 = vmul.f32 %v298_v19, %v298_v19  ;;  %1146 = vmatprep.subr.bf16.mxu0 %v5743_v24  ;;  %v5748_v32 = vld [vmem:[%s6937_s30 + $0x8] ss:$16 sps:$4 sm:$0xff]   ;;  %v5749_v34 = vld [vmem:[%s6937_s30 + $0x24] ss:$16 sps:$4 sm:$0xff]  }
  0x82   : > { %v321_v30 = vadd.f32 %v308_v22, %v307_v20  ;;  %1248 = vmatprep.subr.bf16.mxu1 %v5745_v27  ;;  %1147 = vmatpush1.bf16.msra.mxu0 %v5747_v31  ;;  %v5751_v36 = vld [vmem:[%s6937_s30 + $0x2c] ss:$16 sps:$4 sm:$0xff]   ;;  %v5753_v37 = vld [vmem:[%s6937_s30 + $0x20] ss:$16 sps:$4 sm:$0xff]   ;;  %v5754_v39 = vld [vmem:[%s6937_s30 + $0x28] ss:$16 sps:$4 sm:$0xff]   ;;  %p6614_p3 = pnand %p6613_p13, %p7703_p5 }
  0x83   : > { %v317_v28 = vadd.f32 %v316_v21, %v305_v16  ;;  %v313_v33 = vadd.f32 %v312_v25, %v302_v14  ;;  %1249 = vmatpush1.bf16.msra.mxu1 %v5748_v32  ;;  %1148 = vmatprep.subr.bf16.mxu0 %v5749_v34  ;;  %v5755_v41 = vld [vmem:[%s6937_s30 + $0x44] ss:$16 sps:$4 sm:$0xff]   ;;  %v5757_v42 = vld [vmem:[%s6937_s30 + $0x4c] ss:$16 sps:$4 sm:$0xff]   ;;  %v5759_v43 = vld [vmem:[%s6937_s30 + $0x40] ss:$16 sps:$4 sm:$0xff]  }
  0x84   : > { %v322_v35 = vadd.f32 %v321_v30, %v309_v23  ;;  %1250 = vmatprep.subr.bf16.mxu1 %v5751_v36  ;;  %v5760_v44 = vld [vmem:[%s6937_s30 + $0x48] ss:$16 sps:$4 sm:$0xff]   ;;  %v5761_v45 = vld [vmem:[%s6937_s30 + $0x64] ss:$16 sps:$4 sm:$0xff]   ;;  %v5763_v46 = vld [vmem:[%s6937_s30 + $0x6c] ss:$16 sps:$4 sm:$0xff]   ;;  %p6615_p6 = pneg %p6614_p3 }
  0x85   : > { %314 = vadd.xlane.f32.xlu0 %v313_v33  ;;  %v318_v38 = vadd.f32 %v317_v28, %v306_v26  ;;  %v5765_v47 = vld [vmem:[%s6937_s30 + $0x60] ss:$16 sps:$4 sm:$0xff]   ;;  %v5766_v48 = vld [vmem:[%s6937_s30 + $0x68] ss:$16 sps:$4 sm:$0xff]   ;;  %v5767_v49 = vld [vmem:[%s6937_s30 + $0x84] ss:$16 sps:$4 sm:$0xff]  }
  0x86   : > { %v323_v40 = vadd.f32 %v322_v35, %v310_v29  ;;  %1149 = vmatpush1.bf16.msra.mxu0 %v5753_v37  ;;  %v5769_v50 = vld [vmem:[%s6937_s30 + $0x8c] ss:$16 sps:$4 sm:$0xff]   ;;  %v5771_v51 = vld [vmem:[%s6937_s30 + $0x80] ss:$16 sps:$4 sm:$0xff]   ;;  %v5772_v52 = vld [vmem:[%s6937_s30 + $0x88] ss:$16 sps:$4 sm:$0xff]  }
  0x87   : > { %1251 = vmatpush1.bf16.msra.mxu1 %v5754_v39  ;;  %1150 = vmatprep.subr.bf16.mxu0 %v5755_v41  ;;  %v5773_v53 = vld [vmem:[%s6937_s30 + $0xa4] ss:$16 sps:$4 sm:$0xff]   ;;  %v5775_v54 = vld [vmem:[%s6937_s30 + $0xac] ss:$16 sps:$4 sm:$0xff]   ;;  %v5777_v55 = vld [vmem:[%s6937_s30 + $0xa0] ss:$16 sps:$4 sm:$0xff]  }
  0x88   : > { %324 = vadd.xlane.f32.xlu1 %v323_v40  ;;  %1252 = vmatprep.subr.bf16.mxu1 %v5757_v42  ;;  %v5778_v56 = vld [vmem:[%s6937_s30 + $0xa8] ss:$16 sps:$4 sm:$0xff]   ;;  %v5779_v57 = vld [vmem:[%s6937_s30 + $0xc4] ss:$16 sps:$4 sm:$0xff]   ;;  %v5781_v58 = vld [vmem:[%s6937_s30 + $0xcc] ss:$16 sps:$4 sm:$0xff]  }
  0x89   : > { %319 = vadd.xlane.f32.xlu0 %v318_v38  ;;  %v5783_v59 = vld [vmem:[%s6937_s30 + $0xc0] ss:$16 sps:$4 sm:$0xff]   ;;  %v5784_v60 = vld [vmem:[%s6937_s30 + $0xc8] ss:$16 sps:$4 sm:$0xff]   ;;  %v5785_v61 = vld [vmem:[%s6937_s30 + $0xe4] ss:$16 sps:$4 sm:$0xff]  }
  0x8a   : > { %1151 = vmatpush1.bf16.msra.mxu0 %v5759_v43  ;;  %v5787_v62 = vld [vmem:[%s6937_s30 + $0xec] ss:$16 sps:$4 sm:$0xff]   ;;  %v5789_v63 = vld [vmem:[%s6937_s30 + $0xe0] ss:$16 sps:$4 sm:$0xff]   ;;  %v5790_v3 = vld [vmem:[%s6937_s30 + $0xe8] ss:$16 sps:$4 sm:$0xff]  }
  0x8b   : > { %1253 = vmatpush1.bf16.msra.mxu1 %v5760_v44  ;;  %1152 = vmatprep.subr.bf16.mxu0 %v5761_v45  ;;  %v5791_v4 = vld [vmem:[%s6937_s30 + $0x104] ss:$16 sps:$4 sm:$0xff]   ;;  %v5793_v5 = vld [vmem:[%s6937_s30 + $0x10c] ss:$16 sps:$4 sm:$0xff]   ;;  %v5795_v6 = vld [vmem:[%s6937_s30 + $0x100] ss:$16 sps:$4 sm:$0xff]  }
  0x8c   : > { %1254 = vmatprep.subr.bf16.mxu1 %v5763_v46  ;;  %v5796_v10 = vld [vmem:[%s6937_s30 + $0x108] ss:$16 sps:$4 sm:$0xff]   ;;  %v5797_v11 = vld [vmem:[%s6937_s30 + $0x124] ss:$16 sps:$4 sm:$0xff]   ;;  %v5799_v12 = vld [vmem:[%s6937_s30 + $0x12c] ss:$16 sps:$4 sm:$0xff]  }
  0x8d   : > { %v5801_v13 = vld [vmem:[%s6937_s30 + $0x120] ss:$16 sps:$4 sm:$0xff]   ;;  %v5802_v14 = vld [vmem:[%s6937_s30 + $0x128] ss:$16 sps:$4 sm:$0xff]   ;;  %v5803_v15 = vld [vmem:[%s6937_s30 + $0x144] ss:$16 sps:$4 sm:$0xff]  }
  0x8e   : > { %1153 = vmatpush1.bf16.msra.mxu0 %v5765_v47  ;;  %v5805_v16 = vld [vmem:[%s6937_s30 + $0x14c] ss:$16 sps:$4 sm:$0xff]   ;;  %v5807_v18 = vld [vmem:[%s6937_s30 + $0x140] ss:$16 sps:$4 sm:$0xff]   ;;  %v5808_v19 = vld [vmem:[%s6937_s30 + $0x148] ss:$16 sps:$4 sm:$0xff]  }
  0x8f   : > { %1255 = vmatpush1.bf16.msra.mxu1 %v5766_v48  ;;  %1154 = vmatprep.subr.bf16.mxu0 %v5767_v49  ;;  %v5809_v20 = vld [vmem:[%s6937_s30 + $0x164] ss:$16 sps:$4 sm:$0xff]   ;;  %v5811_v21 = vld [vmem:[%s6937_s30 + $0x16c] ss:$16 sps:$4 sm:$0xff]   ;;  %v5813_v22 = vld [vmem:[%s6937_s30 + $0x160] ss:$16 sps:$4 sm:$0xff]  }
  0x90   : > { %1256 = vmatprep.subr.bf16.mxu1 %v5769_v50  ;;  %v5814_v23 = vld [vmem:[%s6937_s30 + $0x168] ss:$16 sps:$4 sm:$0xff]   ;;  %v5815_v24 = vld [vmem:[%s6937_s30 + $0x184] ss:$16 sps:$4 sm:$0xff]   ;;  %v5817_v25 = vld [vmem:[%s6937_s30 + $0x18c] ss:$16 sps:$4 sm:$0xff]  }
  0x91   : > { %v5819_v26 = vld [vmem:[%s6937_s30 + $0x180] ss:$16 sps:$4 sm:$0xff]   ;;  %v5820_v27 = vld [vmem:[%s6937_s30 + $0x188] ss:$16 sps:$4 sm:$0xff]   ;;  %v5821_v28 = vld [vmem:[%s6937_s30 + $0x1a4] ss:$16 sps:$4 sm:$0xff]  }
  0x92   : > { %1155 = vmatpush1.bf16.msra.mxu0 %v5771_v51  ;;  %v5823_v29 = vld [vmem:[%s6937_s30 + $0x1ac] ss:$16 sps:$4 sm:$0xff]   ;;  %v5825_v30 = vld [vmem:[%s6937_s30 + $0x1a0] ss:$16 sps:$4 sm:$0xff]   ;;  %v5826_v31 = vld [vmem:[%s6937_s30 + $0x1a8] ss:$16 sps:$4 sm:$0xff]  }
  0x93   : > { %1257 = vmatpush1.bf16.msra.mxu1 %v5772_v52  ;;  %1156 = vmatprep.subr.bf16.mxu0 %v5773_v53  ;;  %v5827_v32 = vld [vmem:[%s6937_s30 + $0x1c4] ss:$16 sps:$4 sm:$0xff]   ;;  %v5829_v33 = vld [vmem:[%s6937_s30 + $0x1cc] ss:$16 sps:$4 sm:$0xff]   ;;  %v5831_v34 = vld [vmem:[%s6937_s30 + $0x1c0] ss:$16 sps:$4 sm:$0xff]  }
  0x94   : > { %1258 = vmatprep.subr.bf16.mxu1 %v5775_v54  ;;  %v5832_v35 = vld [vmem:[%s6937_s30 + $0x1c8] ss:$16 sps:$4 sm:$0xff]   ;;  %v5833_v36 = vld [vmem:[%s6937_s30 + $0x1e4] ss:$16 sps:$4 sm:$0xff]   ;;  %v5835_v37 = vld [vmem:[%s6937_s30 + $0x1ec] ss:$16 sps:$4 sm:$0xff]  }
  0x95   : > { %v5837_v38 = vld [vmem:[%s6937_s30 + $0x1e0] ss:$16 sps:$4 sm:$0xff]   ;;  %v5838_v39 = vld [vmem:[%s6937_s30 + $0x1e8] ss:$16 sps:$4 sm:$0xff]   ;;  %v5841_v40 = vld [vmem:[%s6937_s30 + $0x204] ss:$16 sps:$4 sm:$0xff]  }
  0x96   : > { %1157 = vmatpush1.bf16.msra.mxu0 %v5777_v55  ;;  %v5844_v41 = vld [vmem:[%s6937_s30 + $0x20c] ss:$16 sps:$4 sm:$0xff]   ;;  %s6709_s15 = smov [#allocation8]  }
  0x97   : > { %1259 = vmatpush1.bf16.msra.mxu1 %v5778_v56  ;;  %1158 = vmatprep.subr.bf16.mxu0 %v5779_v57  ;;  %s6616_s20 = sshll.u32 %s6709_s15, 4  ;;  %s6617_s20 = int_to_ptr.vmem [resolvable:$false] %s6616_s20 }
  0x98   : > { %1260 = vmatprep.subr.bf16.mxu1 %v5781_v58  ;;  %v5839_v58 = vld [vmem:[%s6937_s30 + $0x200] ss:$16 sps:$4 sm:$0xff]   ;;  %s6618_s1 = scalar_lea.vmem %s6617_s20, 3072  ;;  %p6619_p9 = scmp.lt.s32.totalorder %s7629_s10, %s6617_s20 }
  0x99   : > { %p6620_p11 = scmp.lt.s32.totalorder %s6618_s1, %s6612_s5 }
  0x9a   : > { %1159 = vmatpush1.bf16.msra.mxu0 %v5783_v59  ;;  %v5842_v59 = vld [vmem:[%s6937_s30 + $0x208] ss:$16 sps:$4 sm:$0xff]  }
  0x9b   : > { %1261 = vmatpush1.bf16.msra.mxu1 %v5784_v60  ;;  %1160 = vmatprep.subr.bf16.mxu0 %v5785_v61  ;;  %p6621_p10 = por %p6620_p11, %p6619_p9 }
  0x9c   : > { %1262 = vmatprep.subr.bf16.mxu1 %v5787_v62  ;;  %v5847_v62 = vld [vmem:[%s6937_s30 + $0x224] ss:$16 sps:$4 sm:$0xff]  }
  0x9d   : > { %p6622_p12 = pnand %p6621_p10, %p6615_p6 }
  0x9e   : > { %1161 = vmatpush1.bf16.msra.mxu0 %v5789_v63  ;;  %v5850_v63 = vld [vmem:[%s6937_s30 + $0x22c] ss:$16 sps:$4 sm:$0xff]  }
  0x9f   : > { %1263 = vmatpush1.bf16.msra.mxu1 %v5790_v3  ;;  %1162 = vmatprep.subr.bf16.mxu0 %v5791_v4 }
  0xa0   : > { %1264 = vmatprep.subr.bf16.mxu1 %v5793_v5  ;;  %v5856_v5 = vld [vmem:[%s6937_s30 + $0x24c] ss:$16 sps:$4 sm:$0xff]  }
  0xa2   : > { %1163 = vmatpush1.bf16.msra.mxu0 %v5795_v6 }
  0xa3   : > { %1265 = vmatpush1.bf16.msra.mxu1 %v5796_v10  ;;  %1164 = vmatprep.subr.bf16.mxu0 %v5797_v11  ;;  %v5851_v10 = vld [vmem:[%s6937_s30 + $0x240] ss:$16 sps:$4 sm:$0xff]   ;;  %v5854_v11 = vld [vmem:[%s6937_s30 + $0x248] ss:$16 sps:$4 sm:$0xff]  }
  0xa4   : > { %1266 = vmatprep.subr.bf16.mxu1 %v5799_v12 }
  0xa6   : > { %1165 = vmatpush1.bf16.msra.mxu0 %v5801_v13  ;;  %v6518_v13 = vld [vmem:[%s6929_s28 + $0x38] sm:$0xff] }
  0xa7   : > { %1267 = vmatpush1.bf16.msra.mxu1 %v5802_v14  ;;  %1166 = vmatprep.subr.bf16.mxu0 %v5803_v15  ;;  %v5859_v15 = vld [vmem:[%s6937_s30 + $0x264] ss:$16 sps:$4 sm:$0xff]  }
  0xa8   : > { %1268 = vmatprep.subr.bf16.mxu1 %v5805_v16  ;;  %v5862_v16 = vld [vmem:[%s6937_s30 + $0x26c] ss:$16 sps:$4 sm:$0xff]  }
  0xaa   : > { %1167 = vmatpush1.bf16.msra.mxu0 %v5807_v18  ;;  %v6519_v18 = vld [vmem:[%s6929_s28 + $0x18] sm:$0xff] }
  0xab   : > { %1269 = vmatpush1.bf16.msra.mxu1 %v5808_v19  ;;  %1168 = vmatprep.subr.bf16.mxu0 %v5809_v20  ;;  %v5857_v20 = vld [vmem:[%s6937_s30 + $0x260] ss:$16 sps:$4 sm:$0xff]  }
  0xac   : > { %1270 = vmatprep.subr.bf16.mxu1 %v5811_v21  ;;  %v5860_v21 = vld [vmem:[%s6937_s30 + $0x268] ss:$16 sps:$4 sm:$0xff]  }
  0xae   : > { %1169 = vmatpush1.bf16.msra.mxu0 %v5813_v22 }
  0xaf   : > { %1271 = vmatpush1.bf16.msra.mxu1 %v5814_v23  ;;  %1170 = vmatprep.subr.bf16.mxu0 %v5815_v24  ;;  %v5865_v23 = vld [vmem:[%s6937_s30 + $0x284] ss:$16 sps:$4 sm:$0xff]   ;;  %v5868_v24 = vld [vmem:[%s6937_s30 + $0x28c] ss:$16 sps:$4 sm:$0xff]  }
  0xb0   : > { %1272 = vmatprep.subr.bf16.mxu1 %v5817_v25  ;;  %v5863_v25 = vld [vmem:[%s6937_s30 + $0x280] ss:$16 sps:$4 sm:$0xff]  }
  0xb2   : > { %1171 = vmatpush1.bf16.msra.mxu0 %v5819_v26  ;;  %v5866_v26 = vld [vmem:[%s6937_s30 + $0x288] ss:$16 sps:$4 sm:$0xff]  }
  0xb3   : > { %1273 = vmatpush1.bf16.msra.mxu1 %v5820_v27  ;;  %1172 = vmatprep.subr.bf16.mxu0 %v5821_v28  ;;  %v5871_v27 = vld [vmem:[%s6937_s30 + $0x2a4] ss:$16 sps:$4 sm:$0xff]   ;;  %v5874_v28 = vld [vmem:[%s6937_s30 + $0x2ac] ss:$16 sps:$4 sm:$0xff]  }
  0xb4   : > { %1274 = vmatprep.subr.bf16.mxu1 %v5823_v29  ;;  %v5869_v29 = vld [vmem:[%s6937_s30 + $0x2a0] ss:$16 sps:$4 sm:$0xff]  }
  0xb6   : > { %1173 = vmatpush1.bf16.msra.mxu0 %v5825_v30  ;;  %v5872_v30 = vld [vmem:[%s6937_s30 + $0x2a8] ss:$16 sps:$4 sm:$0xff]  }
  0xb7   : > { %1275 = vmatpush1.bf16.msra.mxu1 %v5826_v31  ;;  %1174 = vmatprep.subr.bf16.mxu0 %v5827_v32  ;;  %v5877_v31 = vld [vmem:[%s6937_s30 + $0x2c4] ss:$16 sps:$4 sm:$0xff]   ;;  %v5880_v32 = vld [vmem:[%s6937_s30 + $0x2cc] ss:$16 sps:$4 sm:$0xff]  }
  0xb8   : > { %1276 = vmatprep.subr.bf16.mxu1 %v5829_v33  ;;  %v5875_v33 = vld [vmem:[%s6937_s30 + $0x2c0] ss:$16 sps:$4 sm:$0xff]  }
  0xba   : > { %1175 = vmatpush1.bf16.msra.mxu0 %v5831_v34  ;;  %v5878_v34 = vld [vmem:[%s6937_s30 + $0x2c8] ss:$16 sps:$4 sm:$0xff]  }
  0xbb   : > { %1277 = vmatpush1.bf16.msra.mxu1 %v5832_v35  ;;  %1176 = vmatprep.subr.bf16.mxu0 %v5833_v36  ;;  %v5883_v35 = vld [vmem:[%s6937_s30 + $0x2e4] ss:$16 sps:$4 sm:$0xff]   ;;  %v5886_v36 = vld [vmem:[%s6937_s30 + $0x2ec] ss:$16 sps:$4 sm:$0xff]  }
  0xbc   : > { %1278 = vmatprep.subr.bf16.mxu1 %v5835_v37  ;;  %v5881_v37 = vld [vmem:[%s6937_s30 + $0x2e0] ss:$16 sps:$4 sm:$0xff]  }
  0xbe   : > { %1177 = vmatpush1.bf16.msra.mxu0 %v5837_v38  ;;  %v5884_v38 = vld [vmem:[%s6937_s30 + $0x2e8] ss:$16 sps:$4 sm:$0xff]  }
  0xbf   : > { %1279 = vmatpush1.bf16.msra.mxu1 %v5838_v39  ;;  %1197 = vmatprep.subr.bf16.mxu0 %v5841_v40  ;;  %v5889_v39 = vld [vmem:[%s6937_s30 + $0x304] ss:$16 sps:$4 sm:$0xff]   ;;  %v5892_v40 = vld [vmem:[%s6937_s30 + $0x30c] ss:$16 sps:$4 sm:$0xff]  }
  0xc0   : > { %1299 = vmatprep.subr.bf16.mxu1 %v5844_v41  ;;  %v5887_v41 = vld [vmem:[%s6937_s30 + $0x300] ss:$16 sps:$4 sm:$0xff]  }
 0x112   : > { %v315_v42 = vpop.xlane.xlu0 %314 }
 0x113   : > { %v327_v43 = vmul.f32 0.001953125, %v315_v42  ;;  %v5890_v42 = vld [vmem:[%s6937_s30 + $0x308] ss:$16 sps:$4 sm:$0xff]  }
 0x115   : > { %v330_v44 = vadd.f32 1e-08, %v327_v43  ;;  %v325_v45 = vpop.xlane.xlu1 %324  ;;  %v5895_v43 = vld [vmem:[%s6937_s30 + $0x324] ss:$16 sps:$4 sm:$0xff]  }
 0x116   : > { %v320_v46 = vpop.xlane.xlu0 %319  ;;  %v329_v47 = vmul.f32 0.001953125, %v325_v45  ;;  %v5893_v45 = vld [vmem:[%s6937_s30 + $0x320] ss:$16 sps:$4 sm:$0xff]  }
 0x117   : > { %v328_v48 = vmul.f32 0.001953125, %v320_v46  ;;  %6511 = vrsqrt.f32 %v330_v44  ;;  %v5898_v44 = vld [vmem:[%s6937_s30 + $0x32c] ss:$16 sps:$4 sm:$0xff]   ;;  %v5896_v46 = vld [vmem:[%s6937_s30 + $0x328] ss:$16 sps:$4 sm:$0xff]  }
 0x118   : > { %v332_v49 = vadd.f32 1e-08, %v329_v47  ;;  %v5901_v47 = vld [vmem:[%s6937_s30 + $0x344] ss:$16 sps:$4 sm:$0xff]  }
 0x119   : > { %v331_v50 = vadd.f32 1e-08, %v328_v48  ;;  %v5904_v48 = vld [vmem:[%s6937_s30 + $0x34c] ss:$16 sps:$4 sm:$0xff]  }
 0x11a   : > { %6513 = vrsqrt.f32 %v332_v49  ;;  %v5899_v49 = vld [vmem:[%s6937_s30 + $0x340] ss:$16 sps:$4 sm:$0xff]  }
 0x11b   : > { %6515 = vrsqrt.f32 %v331_v50  ;;  %v5902_v50 = vld [vmem:[%s6937_s30 + $0x348] ss:$16 sps:$4 sm:$0xff]  }
 0x121   : > { %v6512_v51 = vpop.eup %6511 }
 0x122   : > { %v337_v54 = vmul.f32 %v6512_v51, %v6947_v1  ;;  %v336_v55 = vmul.f32 %v6512_v51, %v6944_v0  ;;  %v338_v56 = vmul.f32 %v6512_v51, %v6950_v2  ;;  %v5845_v2 = vld [vmem:[%s6937_s30 + $0x220] ss:$16 sps:$4 sm:$0xff]   ;;  %v339_v19 = vmul.f32 %v6519_v18, %v6512_v51  ;;  %v5907_v51 = vld [vmem:[%s6937_s30 + $0x364] ss:$16 sps:$4 sm:$0xff]  }
 0x123   : > { %v6521_v18 = vld [vmem:[%s6929_s28 + $0x50] sm:$0xff] }
 0x124   : > { %v7049_v52 = vpop.eup %6513 }
 0x125   : > { %v6516_v53 = vpop.eup %6515  ;;  %v345_v61 = vmul.f32 %v7049_v52, %v6977_v17  ;;  %v5853_v17 = vld [vmem:[%s6937_s30 + $0x244] ss:$16 sps:$4 sm:$0xff]  }
 0x126   : > { %v341_v57 = vmul.f32 %v6516_v53, %v6963_v8  ;;  %v340_v60 = vmul.f32 %v6516_v53, %v6960_v7  ;;  %v342_v1 = vmul.f32 %v6516_v53, %v6966_v9  ;;  %v5848_v8 = vld [vmem:[%s6937_s30 + $0x228] ss:$16 sps:$4 sm:$0xff]   ;;  %v6517_v9 = vld [vmem:[%s6929_s28 + $0x40] sm:$0xff]  ;;  %v343_v14 = vmul.f32 %v6518_v13, %v6516_v53  ;;  %v5910_v53 = vld [vmem:[%s6937_s30 + $0x36c] ss:$16 sps:$4 sm:$0xff]  }
 0x127   : > { %v481_v7 = vpack.c.bf16 %v345_v61, %v345_v61  ;;  %v344_v6 = vmul.f32 %v6517_v9, %v7049_v52  ;;  %v5922_v61 = vld [vmem:[%s6937_s30 + $0x3ac] ss:$16 sps:$4 sm:$0xff]   ;;  %v5937_v9 = vld [vmem:[%s6937_s30 + $0x404] ss:$16 sps:$4 sm:$0xff]   ;;  %v5938_v13 = vld [vmem:[%s6937_s30 + $0x408] ss:$16 sps:$4 sm:$0xff]  }
 0x128   : > { %v477_v0 = vpack.c.bf16 %v341_v57, %v337_v54  ;;  %v476_v3 = vpack.c.bf16 %v340_v60, %v336_v55  ;;  %v7063_v4 = vpack.c.bf16 %v342_v1, %v338_v56  ;;  %v479_v22 = vpack.c.bf16 %v343_v14, %v339_v19  ;;  %v5905_v54 = vld [vmem:[%s6937_s30 + $0x360] ss:$16 sps:$4 sm:$0xff]   ;;  %v5908_v55 = vld [vmem:[%s6937_s30 + $0x368] ss:$16 sps:$4 sm:$0xff]   ;;  %v5913_v56 = vld [vmem:[%s6937_s30 + $0x384] ss:$16 sps:$4 sm:$0xff]  }
 0x129   : > { %v480_v12 = vpack.c.bf16 %v344_v6, %v344_v6  ;;  %v5916_v57 = vld [vmem:[%s6937_s30 + $0x38c] ss:$16 sps:$4 sm:$0xff]   ;;  %v5919_v60 = vld [vmem:[%s6937_s30 + $0x3a4] ss:$16 sps:$4 sm:$0xff]   ;;  %v5917_v1 = vld [vmem:[%s6937_s30 + $0x3a0] ss:$16 sps:$4 sm:$0xff]   ;;  %v346_v19 = vmul.f32 %v6521_v18, %v7049_v52 }
 0x12a   : > { %1178 = vmatprep.mubr.bf16.mxu0 %v477_v0  ;;  %1280 = vmatprep.mubr.bf16.mxu1 %v477_v0  ;;  %v5928_v0 = vld [vmem:[%s6937_s30 + $0x3cc] ss:$16 sps:$4 sm:$0xff]  }
 0x12b   : > { %1179 = vmatmul.mubr.bf16.vlgmr.msra.gmra.mrb[0].mxu0 %v476_v3  ;;  %1281 = vmatmul.mubr.bf16.vlgmr.msra.gmra.mrb[0].mxu1 %v476_v3  ;;  %v5923_v3 = vld [vmem:[%s6937_s30 + $0x3c0] ss:$16 sps:$4 sm:$0xff]   ;;  %v5940_v6 = vld [vmem:[%s6937_s30 + $0x40c] ss:$16 sps:$4 sm:$0xff]  }
 0x12c   : > { %1198 = vmatpush1.bf16.msra.mxu0 %v5839_v58  ;;  %1300 = vmatpush1.bf16.msra.mxu1 %v5842_v59  ;;  %v5911_v58 = vld [vmem:[%s6937_s30 + $0x380] ss:$16 sps:$4 sm:$0xff]   ;;  %v5914_v59 = vld [vmem:[%s6937_s30 + $0x388] ss:$16 sps:$4 sm:$0xff]  }
 0x12d   : > { %1199 = vmatprep.subr.bf16.mxu0 %v5847_v62  ;;  %1301 = vmatprep.subr.bf16.mxu1 %v5850_v63  ;;  %v5920_v62 = vld [vmem:[%s6937_s30 + $0x3a8] ss:$16 sps:$4 sm:$0xff]   ;;  %v5925_v63 = vld [vmem:[%s6937_s30 + $0x3c4] ss:$16 sps:$4 sm:$0xff]  }
 0x12e   : > { %1188 = vmatprep.mubr.bf16.mxu0 %v481_v7  ;;  %1290 = vmatprep.mubr.bf16.mxu1 %v481_v7  ;;  %v5934_v7 = vld [vmem:[%s6937_s30 + $0x3ec] ss:$16 sps:$4 sm:$0xff]  }
 0x130   : > { %1200 = vmatpush1.bf16.msra.mxu0 %v5845_v2  ;;  %1302 = vmatpush1.bf16.msra.mxu1 %v5848_v8  ;;  %v5926_v2 = vld [vmem:[%s6937_s30 + $0x3c8] ss:$16 sps:$4 sm:$0xff]   ;;  %v5931_v8 = vld [vmem:[%s6937_s30 + $0x3e4] ss:$16 sps:$4 sm:$0xff]  }
 0x131   : > { %1201 = vmatprep.subr.bf16.mxu0 %v5853_v17  ;;  %1303 = vmatprep.subr.bf16.mxu1 %v5856_v5  ;;  %v5929_v17 = vld [vmem:[%s6937_s30 + $0x3e0] ss:$16 sps:$4 sm:$0xff]   ;;  %v5932_v5 = vld [vmem:[%s6937_s30 + $0x3e8] ss:$16 sps:$4 sm:$0xff]  }
 0x133   : > { %1189 = vmatmul.mubr.bf16.gmra.mrb[4].mxu0 %v480_v12  ;;  %1291 = vmatmul.mubr.bf16.gmra.mrb[4].mxu1 %v480_v12  ;;  %v5935_v12 = vld [vmem:[%s6937_s30 + $0x400] ss:$16 sps:$4 sm:$0xff]  }
 0x134   : > { %1202 = vmatpush1.bf16.msra.mxu0 %v5851_v10  ;;  %1304 = vmatpush1.bf16.msra.mxu1 %v5854_v11  ;;  %v6520_v10 = vld [vmem:[%s6929_s28 + $0x58] sm:$0xff] }
 0x135   : > { %1229 = vmatprep.mubr.bf16.mxu0 %v479_v22  ;;  %1331 = vmatprep.mubr.bf16.mxu1 %v479_v22  ;;  %v347_v11 = vmul.f32 %v6520_v10, %v7049_v52  ;;  %v5949_v22 = vld [vmem:[%s6937_s30 + $0x444] ss:$16 sps:$4 sm:$0xff]  }
 0x136   : > { %1203 = vmatprep.subr.bf16.mxu0 %v5859_v15  ;;  %1305 = vmatprep.subr.bf16.mxu1 %v5862_v16  ;;  %v5943_v15 = vld [vmem:[%s6937_s30 + $0x424] ss:$16 sps:$4 sm:$0xff]   ;;  %v5946_v16 = vld [vmem:[%s6937_s30 + $0x42c] ss:$16 sps:$4 sm:$0xff]  }
 0x137   : > { %v483_v14 = vpack.c.bf16 %v347_v11, %v347_v11  ;;  %v5955_v52 = vld [vmem:[%s6937_s30 + $0x464] ss:$16 sps:$4 sm:$0xff]   ;;  %v6030_v11 = vld [vmem:[%s6937_s30 + $0x5ec] ss:$16 sps:$4 sm:$0xff]  }
 0x138   : > { %1204 = vmatpush1.bf16.msra.mxu0 %v5857_v20  ;;  %1306 = vmatpush1.bf16.msra.mxu1 %v5860_v21  ;;  %v5941_v20 = vld [vmem:[%s6937_s30 + $0x420] ss:$16 sps:$4 sm:$0xff]   ;;  %v5944_v21 = vld [vmem:[%s6937_s30 + $0x428] ss:$16 sps:$4 sm:$0xff]   ;;  %v6027_v10 = vld [vmem:[%s6937_s30 + $0x5e4] ss:$16 sps:$4 sm:$0xff]  }
 0x139   : > { %1205 = vmatprep.subr.bf16.mxu0 %v5865_v23  ;;  %1307 = vmatprep.subr.bf16.mxu1 %v5868_v24  ;;  %v5952_v23 = vld [vmem:[%s6937_s30 + $0x44c] ss:$16 sps:$4 sm:$0xff]   ;;  %v5947_v24 = vld [vmem:[%s6937_s30 + $0x440] ss:$16 sps:$4 sm:$0xff]  }
 0x13c   : > { %1206 = vmatpush1.bf16.msra.mxu0 %v5863_v25  ;;  %1308 = vmatpush1.bf16.msra.mxu1 %v5866_v26  ;;  %v5950_v25 = vld [vmem:[%s6937_s30 + $0x448] ss:$16 sps:$4 sm:$0xff]   ;;  %v5958_v26 = vld [vmem:[%s6937_s30 + $0x46c] ss:$16 sps:$4 sm:$0xff]  }
 0x13d   : > { %1207 = vmatprep.subr.bf16.mxu0 %v5871_v27  ;;  %1309 = vmatprep.subr.bf16.mxu1 %v5874_v28  ;;  %v5953_v27 = vld [vmem:[%s6937_s30 + $0x460] ss:$16 sps:$4 sm:$0xff]   ;;  %v5956_v28 = vld [vmem:[%s6937_s30 + $0x468] ss:$16 sps:$4 sm:$0xff]  }
 0x140   : > { %1208 = vmatpush1.bf16.msra.mxu0 %v5869_v29  ;;  %1310 = vmatpush1.bf16.msra.mxu1 %v5872_v30  ;;  %v5961_v29 = vld [vmem:[%s6937_s30 + $0x484] ss:$16 sps:$4 sm:$0xff]   ;;  %v5964_v30 = vld [vmem:[%s6937_s30 + $0x48c] ss:$16 sps:$4 sm:$0xff]  }
 0x141   : > { %1209 = vmatprep.subr.bf16.mxu0 %v5877_v31  ;;  %1311 = vmatprep.subr.bf16.mxu1 %v5880_v32  ;;  %v5959_v31 = vld [vmem:[%s6937_s30 + $0x480] ss:$16 sps:$4 sm:$0xff]   ;;  %v5962_v32 = vld [vmem:[%s6937_s30 + $0x488] ss:$16 sps:$4 sm:$0xff]  }
 0x144   : > { %1210 = vmatpush1.bf16.msra.mxu0 %v5875_v33  ;;  %1312 = vmatpush1.bf16.msra.mxu1 %v5878_v34  ;;  %v5967_v33 = vld [vmem:[%s6937_s30 + $0x4a4] ss:$16 sps:$4 sm:$0xff]   ;;  %v5970_v34 = vld [vmem:[%s6937_s30 + $0x4ac] ss:$16 sps:$4 sm:$0xff]  }
 0x145   : > { %1211 = vmatprep.subr.bf16.mxu0 %v5883_v35  ;;  %1313 = vmatprep.subr.bf16.mxu1 %v5886_v36  ;;  %v5965_v35 = vld [vmem:[%s6937_s30 + $0x4a0] ss:$16 sps:$4 sm:$0xff]   ;;  %v5968_v36 = vld [vmem:[%s6937_s30 + $0x4a8] ss:$16 sps:$4 sm:$0xff]  }
 0x148   : > { %1212 = vmatpush1.bf16.msra.mxu0 %v5881_v37  ;;  %1314 = vmatpush1.bf16.msra.mxu1 %v5884_v38  ;;  %v5973_v37 = vld [vmem:[%s6937_s30 + $0x4c4] ss:$16 sps:$4 sm:$0xff]   ;;  %v5976_v38 = vld [vmem:[%s6937_s30 + $0x4cc] ss:$16 sps:$4 sm:$0xff]  }
 0x149   : > { %1213 = vmatprep.subr.bf16.mxu0 %v5889_v39  ;;  %1315 = vmatprep.subr.bf16.mxu1 %v5892_v40  ;;  %v5971_v39 = vld [vmem:[%s6937_s30 + $0x4c0] ss:$16 sps:$4 sm:$0xff]   ;;  %v5974_v40 = vld [vmem:[%s6937_s30 + $0x4c8] ss:$16 sps:$4 sm:$0xff]  }
 0x14c   : > { %1214 = vmatpush1.bf16.msra.mxu0 %v5887_v41  ;;  %1316 = vmatpush1.bf16.msra.mxu1 %v5890_v42  ;;  %v5979_v41 = vld [vmem:[%s6937_s30 + $0x4e4] ss:$16 sps:$4 sm:$0xff]   ;;  %v5982_v42 = vld [vmem:[%s6937_s30 + $0x4ec] ss:$16 sps:$4 sm:$0xff]  }
 0x14d   : > { %1215 = vmatprep.subr.bf16.mxu0 %v5895_v43  ;;  %1317 = vmatprep.subr.bf16.mxu1 %v5898_v44  ;;  %v5977_v43 = vld [vmem:[%s6937_s30 + $0x4e0] ss:$16 sps:$4 sm:$0xff]   ;;  %v5980_v44 = vld [vmem:[%s6937_s30 + $0x4e8] ss:$16 sps:$4 sm:$0xff]  }
 0x150   : > { %1216 = vmatpush1.bf16.msra.mxu0 %v5893_v45  ;;  %1318 = vmatpush1.bf16.msra.mxu1 %v5896_v46  ;;  %v5985_v45 = vld [vmem:[%s6937_s30 + $0x504] ss:$16 sps:$4 sm:$0xff]   ;;  %v5988_v46 = vld [vmem:[%s6937_s30 + $0x50c] ss:$16 sps:$4 sm:$0xff]  }
 0x151   : > { %1217 = vmatprep.subr.bf16.mxu0 %v5901_v47  ;;  %1319 = vmatprep.subr.bf16.mxu1 %v5904_v48  ;;  %v5983_v47 = vld [vmem:[%s6937_s30 + $0x500] ss:$16 sps:$4 sm:$0xff]   ;;  %v5986_v48 = vld [vmem:[%s6937_s30 + $0x508] ss:$16 sps:$4 sm:$0xff]  }
 0x154   : > { %1218 = vmatpush1.bf16.msra.mxu0 %v5899_v49  ;;  %1320 = vmatpush1.bf16.msra.mxu1 %v5902_v50  ;;  %v5991_v49 = vld [vmem:[%s6937_s30 + $0x524] ss:$16 sps:$4 sm:$0xff]   ;;  %v5994_v50 = vld [vmem:[%s6937_s30 + $0x52c] ss:$16 sps:$4 sm:$0xff]  }
 0x155   : > { %1219 = vmatprep.subr.bf16.mxu0 %v5907_v51  ;;  %1321 = vmatprep.subr.bf16.mxu1 %v5910_v53  ;;  %v5989_v51 = vld [vmem:[%s6937_s30 + $0x520] ss:$16 sps:$4 sm:$0xff]   ;;  %v5992_v53 = vld [vmem:[%s6937_s30 + $0x528] ss:$16 sps:$4 sm:$0xff]  }
 0x158   : > { %1220 = vmatpush1.bf16.msra.mxu0 %v5905_v54  ;;  %1322 = vmatpush1.bf16.msra.mxu1 %v5908_v55  ;;  %v5997_v54 = vld [vmem:[%s6937_s30 + $0x544] ss:$16 sps:$4 sm:$0xff]   ;;  %v6000_v55 = vld [vmem:[%s6937_s30 + $0x54c] ss:$16 sps:$4 sm:$0xff]  }
 0x159   : > { %1221 = vmatprep.subr.bf16.mxu0 %v5913_v56  ;;  %1323 = vmatprep.subr.bf16.mxu1 %v5916_v57  ;;  %v5995_v56 = vld [vmem:[%s6937_s30 + $0x540] ss:$16 sps:$4 sm:$0xff]   ;;  %v5998_v57 = vld [vmem:[%s6937_s30 + $0x548] ss:$16 sps:$4 sm:$0xff]  }
 0x15c   : > { %1222 = vmatpush1.bf16.msra.mxu0 %v5911_v58  ;;  %1324 = vmatpush1.bf16.msra.mxu1 %v5914_v59  ;;  %v6003_v58 = vld [vmem:[%s6937_s30 + $0x564] ss:$16 sps:$4 sm:$0xff]   ;;  %v6006_v59 = vld [vmem:[%s6937_s30 + $0x56c] ss:$16 sps:$4 sm:$0xff]  }
 0x15d   : > { %1223 = vmatprep.subr.bf16.mxu0 %v5919_v60  ;;  %1325 = vmatprep.subr.bf16.mxu1 %v5922_v61  ;;  %v6001_v60 = vld [vmem:[%s6937_s30 + $0x560] ss:$16 sps:$4 sm:$0xff]   ;;  %v6004_v61 = vld [vmem:[%s6937_s30 + $0x568] ss:$16 sps:$4 sm:$0xff]  }
 0x160   : > { %1224 = vmatpush1.bf16.msra.mxu0 %v5917_v1  ;;  %1326 = vmatpush1.bf16.msra.mxu1 %v5920_v62  ;;  %v6009_v1 = vld [vmem:[%s6937_s30 + $0x584] ss:$16 sps:$4 sm:$0xff]   ;;  %v6012_v62 = vld [vmem:[%s6937_s30 + $0x58c] ss:$16 sps:$4 sm:$0xff]  }
 0x161   : > { %1225 = vmatprep.subr.bf16.mxu0 %v5925_v63  ;;  %1327 = vmatprep.subr.bf16.mxu1 %v5928_v0  ;;  %v6007_v63 = vld [vmem:[%s6937_s30 + $0x580] ss:$16 sps:$4 sm:$0xff]   ;;  %v6010_v0 = vld [vmem:[%s6937_s30 + $0x588] ss:$16 sps:$4 sm:$0xff]  }
 0x164   : > { %1226 = vmatpush1.bf16.msra.mxu0 %v5923_v3  ;;  %1328 = vmatpush1.bf16.msra.mxu1 %v5926_v2  ;;  %v6015_v3 = vld [vmem:[%s6937_s30 + $0x5a4] ss:$16 sps:$4 sm:$0xff]   ;;  %v6018_v2 = vld [vmem:[%s6937_s30 + $0x5ac] ss:$16 sps:$4 sm:$0xff]  }
 0x165   : > { %1227 = vmatprep.subr.bf16.mxu0 %v5931_v8  ;;  %1329 = vmatprep.subr.bf16.mxu1 %v5934_v7  ;;  %v6013_v8 = vld [vmem:[%s6937_s30 + $0x5a0] ss:$16 sps:$4 sm:$0xff]   ;;  %v6016_v7 = vld [vmem:[%s6937_s30 + $0x5a8] ss:$16 sps:$4 sm:$0xff]  }
 0x168   : > { %1228 = vmatpush1.bf16.msra.mxu0 %v5929_v17  ;;  %1330 = vmatpush1.bf16.msra.mxu1 %v5932_v5  ;;  %v6021_v17 = vld [vmem:[%s6937_s30 + $0x5c4] ss:$16 sps:$4 sm:$0xff]   ;;  %v6024_v5 = vld [vmem:[%s6937_s30 + $0x5cc] ss:$16 sps:$4 sm:$0xff]  }
 0x169   : > { %2174 = vmatprep.subr.bf16.mxu0 %v5937_v9  ;;  %2276 = vmatprep.subr.bf16.mxu1 %v5940_v6  ;;  %v6019_v9 = vld [vmem:[%s6937_s30 + $0x5c0] ss:$16 sps:$4 sm:$0xff]   ;;  %v6022_v6 = vld [vmem:[%s6937_s30 + $0x5c8] ss:$16 sps:$4 sm:$0xff]  }
 0x16b   : > { %1230 = vmatmul.mubr.bf16.vlgmr.msra.gmra.mrb[0].mxu0 %v7063_v4  ;;  %1332 = vmatmul.mubr.bf16.vlgmr.msra.gmra.mrb[0].mxu1 %v7063_v4  ;;  %v482_v4 = vpack.c.bf16 %v346_v19, %v346_v19 }
 0x16c   : > { %1239 = vmatprep.mubr.bf16.mxu0 %v483_v14  ;;  %1341 = vmatprep.mubr.bf16.mxu1 %v483_v14  ;;  %v6033_v14 = vld [vmem:[%s6937_s30 + $0x604] ss:$16 sps:$4 sm:$0xff]  }
 0x16d   : > { %2175 = vmatpush1.bf16.msra.mxu0 %v5935_v12  ;;  %2277 = vmatpush1.bf16.msra.mxu1 %v5938_v13  ;;  %v6025_v12 = vld [vmem:[%s6937_s30 + $0x5e0] ss:$16 sps:$4 sm:$0xff]   ;;  %v6028_v13 = vld [vmem:[%s6937_s30 + $0x5e8] ss:$16 sps:$4 sm:$0xff]  }
 0x16e   : > { %2176 = vmatprep.subr.bf16.mxu0 %v5943_v15  ;;  %2278 = vmatprep.subr.bf16.mxu1 %v5946_v16  ;;  %v6036_v15 = vld [vmem:[%s6937_s30 + $0x60c] ss:$16 sps:$4 sm:$0xff]   ;;  %v486_v16 = vlaneseq }
 0x170   : > { %v487_v18 = vshrl.u32 %v486_v16, 7  ;;  %v6037_v16 = vld [vmem:[%s6937_s30 + $0x620] ss:$16 sps:$4 sm:$0xff]  }
 0x171   : > { %2177 = vmatpush1.bf16.msra.mxu0 %v5941_v20  ;;  %2279 = vmatpush1.bf16.msra.mxu1 %v5944_v21  ;;  %v484_v21 = vld [vmem:[%s7204_s24] sm:$0xf] }
 0x172   : > { %2178 = vmatprep.subr.bf16.mxu0 %v5949_v22  ;;  %2280 = vmatprep.subr.bf16.mxu1 %v5952_v23  ;;  %v7200_v19 = vsub.s32 0, %v487_v18  ;;  %v7202_v20 = vsub.s32 2, %v487_v18  ;;  %v7207_v22 = vsub.s32 1, %v487_v18  ;;  %v7209_v23 = vsub.s32 3, %v487_v18  ;;  %v6040_v18 = vld [vmem:[%s6937_s30 + $0x628] ss:$16 sps:$4 sm:$0xff]  }
 0x173   : > { %1240 = vmatmul.mubr.bf16.gmra.mrb[4].mxu0 %v482_v4  ;;  %1342 = vmatmul.mubr.bf16.gmra.mrb[4].mxu1 %v482_v4 }
 0x174   : > { %v489_v4 = vrot.slane %v484_v21, %v7200_v19 }
 0x175   : > { %2179 = vmatpush1.bf16.msra.mxu0 %v5947_v24  ;;  %2281 = vmatpush1.bf16.msra.mxu1 %v5950_v25  ;;  %v7213_v24 = vrot.slane %v484_v21, %v7202_v20  ;;  %v493_v25 = vrot.slane %v484_v21, %v7207_v22 }
 0x176   : > { %2180 = vmatprep.subr.bf16.mxu0 %v5955_v52  ;;  %2282 = vmatprep.subr.bf16.mxu1 %v5958_v26  ;;  %v7217_v52 = vrot.slane %v484_v21, %v7209_v23 }
 0x179   : > { %2181 = vmatpush1.bf16.msra.mxu0 %v5953_v27  ;;  %2283 = vmatpush1.bf16.msra.mxu1 %v5956_v28 }
 0x17a   : > { %2182 = vmatprep.subr.bf16.mxu0 %v5961_v29  ;;  %2284 = vmatprep.subr.bf16.mxu1 %v5964_v30 }
 0x17d   : > { %2183 = vmatpush1.bf16.msra.mxu0 %v5959_v31  ;;  %2285 = vmatpush1.bf16.msra.mxu1 %v5962_v32 }
 0x17e   : > { %2184 = vmatprep.subr.bf16.mxu0 %v5967_v33  ;;  %2286 = vmatprep.subr.bf16.mxu1 %v5970_v34 }
 0x181   : > { %2185 = vmatpush1.bf16.msra.mxu0 %v5965_v35  ;;  %2287 = vmatpush1.bf16.msra.mxu1 %v5968_v36 }
 0x182   : > { %2186 = vmatprep.subr.bf16.mxu0 %v5973_v37  ;;  %2288 = vmatprep.subr.bf16.mxu1 %v5976_v38 }
 0x185   : > { %2187 = vmatpush1.bf16.msra.mxu0 %v5971_v39  ;;  %2289 = vmatpush1.bf16.msra.mxu1 %v5974_v40 }
 0x186   : > { %2188 = vmatprep.subr.bf16.mxu0 %v5979_v41  ;;  %2290 = vmatprep.subr.bf16.mxu1 %v5982_v42 }
 0x189   : > { %2189 = vmatpush1.bf16.msra.mxu0 %v5977_v43  ;;  %2291 = vmatpush1.bf16.msra.mxu1 %v5980_v44 }
 0x18a   : > { %2190 = vmatprep.subr.bf16.mxu0 %v5985_v45  ;;  %2292 = vmatprep.subr.bf16.mxu1 %v5988_v46 }
 0x18d   : > { %2191 = vmatpush1.bf16.msra.mxu0 %v5983_v47  ;;  %2293 = vmatpush1.bf16.msra.mxu1 %v5986_v48 }
 0x18e   : > { %2192 = vmatprep.subr.bf16.mxu0 %v5991_v49  ;;  %2294 = vmatprep.subr.bf16.mxu1 %v5994_v50 }
 0x191   : > { %2193 = vmatpush1.bf16.msra.mxu0 %v5989_v51  ;;  %2295 = vmatpush1.bf16.msra.mxu1 %v5992_v53 }
 0x192   : > { %2194 = vmatprep.subr.bf16.mxu0 %v5997_v54  ;;  %2296 = vmatprep.subr.bf16.mxu1 %v6000_v55 }
 0x195   : > { %2195 = vmatpush1.bf16.msra.mxu0 %v5995_v56  ;;  %2297 = vmatpush1.bf16.msra.mxu1 %v5998_v57 }
 0x196   : > { %2196 = vmatprep.subr.bf16.mxu0 %v6003_v58  ;;  %2298 = vmatprep.subr.bf16.mxu1 %v6006_v59 }
 0x199   : > { %2197 = vmatpush1.bf16.msra.mxu0 %v6001_v60  ;;  %2299 = vmatpush1.bf16.msra.mxu1 %v6004_v61 }
 0x19a   : > { %2198 = vmatprep.subr.bf16.mxu0 %v6009_v1  ;;  %2300 = vmatprep.subr.bf16.mxu1 %v6012_v62 }
 0x19d   : > { %2199 = vmatpush1.bf16.msra.mxu0 %v6007_v63  ;;  %2301 = vmatpush1.bf16.msra.mxu1 %v6010_v0 }
 0x19e   : > { %2200 = vmatprep.subr.bf16.mxu0 %v6015_v3  ;;  %2302 = vmatprep.subr.bf16.mxu1 %v6018_v2  ;;  %v6031_v3 = vld [vmem:[%s6937_s30 + $0x600] ss:$16 sps:$4 sm:$0xff]  }
 0x1a1   : > { %2201 = vmatpush1.bf16.msra.mxu0 %v6013_v8  ;;  %2303 = vmatpush1.bf16.msra.mxu1 %v6016_v7 }
 0x1a2   : > { %2202 = vmatprep.subr.bf16.mxu0 %v6021_v17  ;;  %2304 = vmatprep.subr.bf16.mxu1 %v6024_v5  ;;  %v6034_v5 = vld [vmem:[%s6937_s30 + $0x608] ss:$16 sps:$4 sm:$0xff]  }
 0x1a5   : > { %2203 = vmatpush1.bf16.msra.mxu0 %v6019_v9  ;;  %2305 = vmatpush1.bf16.msra.mxu1 %v6022_v6  ;;  %v6039_v9 = vld [vmem:[%s6937_s30 + $0x624] ss:$16 sps:$4 sm:$0xff]  }
 0x1a6   : > { %2204 = vmatprep.subr.bf16.mxu0 %v6027_v10  ;;  %2306 = vmatprep.subr.bf16.mxu1 %v6030_v11 }
 0x1a9   : > { %2205 = vmatpush1.bf16.msra.mxu0 %v6025_v12  ;;  %2307 = vmatpush1.bf16.msra.mxu1 %v6028_v13  ;;  %v6042_v13 = vld [vmem:[%s6937_s30 + $0x62c] ss:$16 sps:$4 sm:$0xff]  }
 0x1aa   : > { %2225 = vmatprep.subr.bf16.mxu0 %v6033_v14  ;;  %2327 = vmatprep.subr.bf16.mxu1 %v6036_v15 }
 0x23e   : > { %v1231_v26 = vpop.f32.mrb[0].mxu0  ;;  %v1333_v27 = vpop.f32.mrb[0].mxu1 }
 0x23f   : > { %v5547_v28 = vadd.f32 %v1231_v26, %v489_v4  ;;  %v5553_v29 = vadd.f32 %v1333_v27, %v7213_v24  ;;  %v1233_v30 = vpop.f32.mrb[1].mxu0  ;;  %v1335_v31 = vpop.f32.mrb[1].mxu1  ;;  %v6048_v26 = vld [vmem:[%s6937_s30 + $0x64c] ss:$16 sps:$4 sm:$0xff]   ;;  %v6043_v27 = vld [vmem:[%s6937_s30 + $0x640] ss:$16 sps:$4 sm:$0xff]  }
 0x240   : > { %v5548_v32 = vadd.f32 %v1233_v30, %v493_v25  ;;  %v5554_v33 = vadd.f32 %v1335_v31, %v7217_v52  ;;  %v1235_v34 = vpop.f32.mrb[2].mxu0  ;;  %v1337_v35 = vpop.f32.mrb[2].mxu1  ;;  %v6051_v30 = vld [vmem:[%s6937_s30 + $0x664] ss:$16 sps:$4 sm:$0xff]   ;;  %v6054_v31 = vld [vmem:[%s6937_s30 + $0x66c] ss:$16 sps:$4 sm:$0xff]  }
 0x241   : > { %v1350_v36 = vmul.f32 0.2, %v5547_v28  ;;  %v1352_v37 = vmul.f32 0.2, %v5553_v29  ;;  %v5549_v38 = vadd.f32 %v1235_v34, %v489_v4  ;;  %v5555_v39 = vadd.f32 %v1337_v35, %v7213_v24  ;;  %v1237_v40 = vpop.f32.mrb[3].mxu0  ;;  %v1339_v41 = vpop.f32.mrb[3].mxu1 }
 0x242   : > { %v1351_v42 = vmul.f32 0.2, %v5548_v32  ;;  %v1353_v43 = vmul.f32 0.2, %v5554_v33  ;;  %v5550_v44 = vadd.f32 %v1237_v40, %v493_v25  ;;  %v5556_v45 = vadd.f32 %v1339_v41, %v7217_v52  ;;  %v6057_v34 = vld [vmem:[%s6937_s30 + $0x684] ss:$16 sps:$4 sm:$0xff]  }
 0x243   : > { %v1354_v46 = vmul.f32 0.2, %v5549_v38  ;;  %v1356_v47 = vmul.f32 0.2, %v5555_v39  ;;  %v1362_v50 = vmax.f32 %v5547_v28, %v1350_v36  ;;  %v1364_v51 = vmax.f32 %v5553_v29, %v1352_v37  ;;  %v6046_v28 = vld [vmem:[%s6937_s30 + $0x648] ss:$16 sps:$4 sm:$0xff]  }
 0x244   : > { %v1355_v48 = vmul.f32 0.2, %v5550_v44  ;;  %v1357_v49 = vmul.f32 0.2, %v5556_v45  ;;  %v1363_v55 = vmax.f32 %v5548_v32, %v1351_v42  ;;  %v1365_v56 = vmax.f32 %v5554_v33, %v1353_v43  ;;  %v6049_v32 = vld [vmem:[%s6937_s30 + $0x660] ss:$16 sps:$4 sm:$0xff]  }
 0x245   : > { %v1366_v53 = vmax.f32 %v5549_v38, %v1354_v46  ;;  %v1368_v54 = vmax.f32 %v5555_v39, %v1356_v47  ;;  %v6052_v33 = vld [vmem:[%s6937_s30 + $0x668] ss:$16 sps:$4 sm:$0xff]   ;;  %v6060_v35 = vld [vmem:[%s6937_s30 + $0x68c] ss:$16 sps:$4 sm:$0xff]   ;;  %v6055_v36 = vld [vmem:[%s6937_s30 + $0x680] ss:$16 sps:$4 sm:$0xff]  }
 0x246   : > { %v1367_v57 = vmax.f32 %v5550_v44, %v1355_v48  ;;  %v1369_v58 = vmax.f32 %v5556_v45, %v1357_v49  ;;  %v1241_v59 = vpop.f32.mrb[4].mxu0  ;;  %v7223_v60 = vpop.f32.mrb[4].mxu1  ;;  %v6058_v37 = vld [vmem:[%s6937_s30 + $0x688] ss:$16 sps:$4 sm:$0xff]   ;;  %v6063_v38 = vld [vmem:[%s6937_s30 + $0x6a4] ss:$16 sps:$4 sm:$0xff]  }
 0x247   : > { %v1503_v61 = vpack.c.bf16 %v1366_v53, %v1362_v50  ;;  %v7225_v1 = vpack.c.bf16 %v1368_v54, %v1364_v51  ;;  %v5551_v62 = vadd.f32 %v1241_v59, %v489_v4  ;;  %v1243_v63 = vpop.f32.mrb[5].mxu0  ;;  %v7227_v0 = vpop.f32.mrb[5].mxu1  ;;  %v6066_v39 = vld [vmem:[%s6937_s30 + $0x6ac] ss:$16 sps:$4 sm:$0xff]   ;;  %v6061_v40 = vld [vmem:[%s6937_s30 + $0x6a0] ss:$16 sps:$4 sm:$0xff]  }
 0x248   : > { %v5552_v2 = vadd.f32 %v1243_v63, %v493_v25  ;;  %v1245_v8 = vpop.f32.mrb[6].mxu0  ;;  %v1347_v7 = vpop.f32.mrb[6].mxu1  ;;  %v1504_v17 = vpack.c.bf16 %v1367_v57, %v1363_v55  ;;  %v1506_v6 = vpack.c.bf16 %v1369_v58, %v1365_v56  ;;  %v6045_v25 = vld [vmem:[%s6937_s30 + $0x644] ss:$16 sps:$4 sm:$0xff]   ;;  %v6064_v41 = vld [vmem:[%s6937_s30 + $0x6a8] ss:$16 sps:$4 sm:$0xff]  }
 0x249   : > { %v1358_v10 = vmul.f32 0.2, %v5551_v62  ;;  %v1246_v11 = vpop.f32.mrb[7].mxu0  ;;  %v1348_v12 = vpop.f32.mrb[7].mxu1  ;;  %v6069_v42 = vld [vmem:[%s6937_s30 + $0x6c4] ss:$16 sps:$4 sm:$0xff]  }
 0x24a   : > { %v1359_v14 = vmul.f32 0.2, %v5552_v2  ;;  %2206 = vmatprep.mubr.bf16.mxu0 %v1504_v17  ;;  %2308 = vmatprep.mubr.bf16.mxu1 %v1504_v17  ;;  %v6072_v43 = vld [vmem:[%s6937_s30 + $0x6cc] ss:$16 sps:$4 sm:$0xff]   ;;  %v6067_v44 = vld [vmem:[%s6937_s30 + $0x6c0] ss:$16 sps:$4 sm:$0xff]  }
 0x24b   : > { %2207 = vmatmul.mubr.bf16.vlgmr.msra.gmra.mrb[8].mxu0 %v1503_v61  ;;  %2309 = vmatmul.mubr.bf16.vlgmr.msra.gmra.mrb[8].mxu1 %v1503_v61  ;;  %v1370_v21 = vmax.f32 %v5551_v62, %v1358_v10  ;;  %v6070_v45 = vld [vmem:[%s6937_s30 + $0x6c8] ss:$16 sps:$4 sm:$0xff]   ;;  %v6075_v46 = vld [vmem:[%s6937_s30 + $0x6e4] ss:$16 sps:$4 sm:$0xff]   ;;  %v6078_v47 = vld [vmem:[%s6937_s30 + $0x6ec] ss:$16 sps:$4 sm:$0xff]  }
 0x24c   : > { %v1371_v15 = vmax.f32 %v5552_v2, %v1359_v14  ;;  %2226 = vmatpush1.bf16.msra.mxu0 %v6031_v3  ;;  %2328 = vmatpush1.bf16.msra.mxu1 %v6034_v5  ;;  %v6073_v48 = vld [vmem:[%s6937_s30 + $0x6e0] ss:$16 sps:$4 sm:$0xff]   ;;  %v6076_v49 = vld [vmem:[%s6937_s30 + $0x6e8] ss:$16 sps:$4 sm:$0xff]   ;;  %v6081_v50 = vld [vmem:[%s6937_s30 + $0x704] ss:$16 sps:$4 sm:$0xff]  }
 0x24d   : > { %2227 = vmatprep.subr.bf16.mxu0 %v6039_v9  ;;  %2329 = vmatprep.subr.bf16.mxu1 %v6042_v13  ;;  %v1507_v29 = vpack.c.bf16 %v1370_v21, %v1370_v21  ;;  %v6084_v51 = vld [vmem:[%s6937_s30 + $0x70c] ss:$16 sps:$4 sm:$0xff]   ;;  %v6079_v53 = vld [vmem:[%s6937_s30 + $0x700] ss:$16 sps:$4 sm:$0xff]   ;;  %v6082_v54 = vld [vmem:[%s6937_s30 + $0x708] ss:$16 sps:$4 sm:$0xff]  }
 0x24e   : > { %v1508_v4 = vpack.c.bf16 %v1371_v15, %v1371_v15  ;;  %v6087_v55 = vld [vmem:[%s6937_s30 + $0x724] ss:$16 sps:$4 sm:$0xff]   ;;  %v6090_v56 = vld [vmem:[%s6937_s30 + $0x72c] ss:$16 sps:$4 sm:$0xff]   ;;  %v6085_v57 = vld [vmem:[%s6937_s30 + $0x720] ss:$16 sps:$4 sm:$0xff]  }
 0x24f   : > { %v6088_v58 = vld [vmem:[%s6937_s30 + $0x728] ss:$16 sps:$4 sm:$0xff]   ;;  %v6093_v59 = vld [vmem:[%s6937_s30 + $0x744] ss:$16 sps:$4 sm:$0xff]   ;;  %v6096_v61 = vld [vmem:[%s6937_s30 + $0x74c] ss:$16 sps:$4 sm:$0xff]  }
 0x250   : > { %2228 = vmatpush1.bf16.msra.mxu0 %v6037_v16  ;;  %2330 = vmatpush1.bf16.msra.mxu1 %v6040_v18  ;;  %v6091_v62 = vld [vmem:[%s6937_s30 + $0x740] ss:$16 sps:$4 sm:$0xff]   ;;  %v6094_v63 = vld [vmem:[%s6937_s30 + $0x748] ss:$16 sps:$4 sm:$0xff]   ;;  %v6099_v3 = vld [vmem:[%s6937_s30 + $0x764] ss:$16 sps:$4 sm:$0xff]   ;;  %v5558_v16 = vadd.f32 %v7227_v0, %v7217_v52  ;;  %v5557_v52 = vadd.f32 %v7223_v60, %v7213_v24 }
 0x251   : > { %2216 = vmatprep.mubr.bf16.mxu0 %v1508_v4  ;;  %2318 = vmatprep.mubr.bf16.mxu1 %v1508_v4  ;;  %v6102_v2 = vld [vmem:[%s6937_s30 + $0x76c] ss:$16 sps:$4 sm:$0xff]   ;;  %v6097_v8 = vld [vmem:[%s6937_s30 + $0x760] ss:$16 sps:$4 sm:$0xff]   ;;  %v6100_v7 = vld [vmem:[%s6937_s30 + $0x768] ss:$16 sps:$4 sm:$0xff]  }
 0x252   : > { %2229 = vmatprep.subr.bf16.mxu0 %v6045_v25  ;;  %2331 = vmatprep.subr.bf16.mxu1 %v6048_v26  ;;  %v6105_v17 = vld [vmem:[%s6937_s30 + $0x784] ss:$16 sps:$4 sm:$0xff]   ;;  %v6108_v5 = vld [vmem:[%s6937_s30 + $0x78c] ss:$16 sps:$4 sm:$0xff]   ;;  %v6103_v9 = vld [vmem:[%s6937_s30 + $0x780] ss:$16 sps:$4 sm:$0xff]  }
 0x253   : > { %2217 = vmatmul.mubr.bf16.gmra.mrb[12].mxu0 %v1507_v29  ;;  %2319 = vmatmul.mubr.bf16.gmra.mrb[12].mxu1 %v1507_v29  ;;  %v6111_v10 = vld [vmem:[%s6937_s30 + $0x7a4] ss:$16 sps:$4 sm:$0xff]   ;;  %v6114_v11 = vld [vmem:[%s6937_s30 + $0x7ac] ss:$16 sps:$4 sm:$0xff]   ;;  %v6109_v12 = vld [vmem:[%s6937_s30 + $0x7a0] ss:$16 sps:$4 sm:$0xff]  }
 0x254   : > { %2230 = vmatpush1.bf16.msra.mxu0 %v6043_v27  ;;  %2332 = vmatpush1.bf16.msra.mxu1 %v6046_v28  ;;  %v6112_v13 = vld [vmem:[%s6937_s30 + $0x7a8] ss:$16 sps:$4 sm:$0xff]   ;;  %v6117_v14 = vld [vmem:[%s6937_s30 + $0x7c4] ss:$16 sps:$4 sm:$0xff]   ;;  %v6120_v15 = vld [vmem:[%s6937_s30 + $0x7cc] ss:$16 sps:$4 sm:$0xff]  }
 0x255   : > { %2257 = vmatprep.mubr.bf16.mxu0 %v1506_v6  ;;  %2359 = vmatprep.mubr.bf16.mxu1 %v1506_v6  ;;  %v6106_v6 = vld [vmem:[%s6937_s30 + $0x788] ss:$16 sps:$4 sm:$0xff]   ;;  %v6115_v18 = vld [vmem:[%s6937_s30 + $0x7c0] ss:$16 sps:$4 sm:$0xff]   ;;  %v6123_v4 = vld [vmem:[%s6937_s30 + $0x7e4] ss:$16 sps:$4 sm:$0xff]  }
 0x256   : > { %2231 = vmatprep.subr.bf16.mxu0 %v6051_v30  ;;  %2333 = vmatprep.subr.bf16.mxu1 %v6054_v31  ;;  %v6118_v21 = vld [vmem:[%s6937_s30 + $0x7c8] ss:$16 sps:$4 sm:$0xff]   ;;  %v6126_v25 = vld [vmem:[%s6937_s30 + $0x7ec] ss:$16 sps:$4 sm:$0xff]   ;;  %v1361_v26 = vmul.f32 0.2, %v5558_v16 }
 0x257   : > { %v6121_v27 = vld [vmem:[%s6937_s30 + $0x7e0] ss:$16 sps:$4 sm:$0xff]   ;;  %v6124_v28 = vld [vmem:[%s6937_s30 + $0x7e8] ss:$16 sps:$4 sm:$0xff]   ;;  %v6129_v0 = vld [vmem:[%s6937_s30 + $0x804] ss:$16 sps:$4 sm:$0xff]  }
 0x258   : > { %2232 = vmatpush1.bf16.msra.mxu0 %v6049_v32  ;;  %2334 = vmatpush1.bf16.msra.mxu1 %v6052_v33  ;;  %v6132_v29 = vld [vmem:[%s6937_s30 + $0x80c] ss:$16 sps:$4 sm:$0xff]   ;;  %v1373_v30 = vmax.f32 %v5558_v16, %v1361_v26  ;;  %v1360_v31 = vmul.f32 0.2, %v5557_v52  ;;  %v6127_v32 = vld [vmem:[%s6937_s30 + $0x800] ss:$16 sps:$4 sm:$0xff]  }
 0x259   : > { %2233 = vmatprep.subr.bf16.mxu0 %v6057_v34  ;;  %2335 = vmatprep.subr.bf16.mxu1 %v6060_v35  ;;  %v6130_v33 = vld [vmem:[%s6937_s30 + $0x808] ss:$16 sps:$4 sm:$0xff]   ;;  %v6135_v35 = vld [vmem:[%s6937_s30 + $0x824] ss:$16 sps:$4 sm:$0xff]   ;;  %v6133_v60 = vld [vmem:[%s6937_s30 + $0x820] ss:$16 sps:$4 sm:$0xff]  }
 0x25a   : > { %v1510_v34 = vpack.c.bf16 %v1373_v30, %v1373_v30  ;;  %v1372_v24 = vmax.f32 %v5557_v52, %v1360_v31  ;;  %v6193_v16 = vld [vmem:[%s6937_s30 + $0x960] ss:$16 sps:$4 sm:$0xff]   ;;  %v6202_v26 = vld [vmem:[%s6937_s30 + $0x988] ss:$16 sps:$4 sm:$0xff]   ;;  %v6216_v30 = vld [vmem:[%s6937_s30 + $0x9cc] ss:$16 sps:$4 sm:$0xff]  }
 0x25b   : > { %v6205_v52 = vld [vmem:[%s6937_s30 + $0x9a0] ss:$16 sps:$4 sm:$0xff]  }
 0x25c   : > { %2234 = vmatpush1.bf16.msra.mxu0 %v6055_v36  ;;  %2336 = vmatpush1.bf16.msra.mxu1 %v6058_v37  ;;  %v6138_v36 = vld [vmem:[%s6937_s30 + $0x82c] ss:$16 sps:$4 sm:$0xff]   ;;  %v6136_v37 = vld [vmem:[%s6937_s30 + $0x828] ss:$16 sps:$4 sm:$0xff]   ;;  %v6211_v31 = vld [vmem:[%s6937_s30 + $0x9c0] ss:$16 sps:$4 sm:$0xff]  }
 0x25d   : > { %2235 = vmatprep.subr.bf16.mxu0 %v6063_v38  ;;  %2337 = vmatprep.subr.bf16.mxu1 %v6066_v39  ;;  %v6141_v38 = vld [vmem:[%s6937_s30 + $0x844] ss:$16 sps:$4 sm:$0xff]   ;;  %v6144_v39 = vld [vmem:[%s6937_s30 + $0x84c] ss:$16 sps:$4 sm:$0xff]  }
 0x260   : > { %2236 = vmatpush1.bf16.msra.mxu0 %v6061_v40  ;;  %2338 = vmatpush1.bf16.msra.mxu1 %v6064_v41  ;;  %v1509_v40 = vpack.c.bf16 %v1372_v24, %v1372_v24  ;;  %v6142_v41 = vld [vmem:[%s6937_s30 + $0x848] ss:$16 sps:$4 sm:$0xff]   ;;  %v6225_v24 = vld [vmem:[%s6937_s30 + $0xa04] ss:$16 sps:$4 sm:$0xff]  }
 0x261   : > { %2237 = vmatprep.subr.bf16.mxu0 %v6069_v42  ;;  %2339 = vmatprep.subr.bf16.mxu1 %v6072_v43  ;;  %v6147_v42 = vld [vmem:[%s6937_s30 + $0x864] ss:$16 sps:$4 sm:$0xff]   ;;  %v6150_v43 = vld [vmem:[%s6937_s30 + $0x86c] ss:$16 sps:$4 sm:$0xff]  }
 0x264   : > { %2238 = vmatpush1.bf16.msra.mxu0 %v6067_v44  ;;  %2340 = vmatpush1.bf16.msra.mxu1 %v6070_v45  ;;  %v6145_v44 = vld [vmem:[%s6937_s30 + $0x860] ss:$16 sps:$4 sm:$0xff]   ;;  %v6148_v45 = vld [vmem:[%s6937_s30 + $0x868] ss:$16 sps:$4 sm:$0xff]  }
 0x265   : > { %2239 = vmatprep.subr.bf16.mxu0 %v6075_v46  ;;  %2341 = vmatprep.subr.bf16.mxu1 %v6078_v47  ;;  %v6153_v46 = vld [vmem:[%s6937_s30 + $0x884] ss:$16 sps:$4 sm:$0xff]   ;;  %v6156_v47 = vld [vmem:[%s6937_s30 + $0x88c] ss:$16 sps:$4 sm:$0xff]  }
 0x268   : > { %2240 = vmatpush1.bf16.msra.mxu0 %v6073_v48  ;;  %2342 = vmatpush1.bf16.msra.mxu1 %v6076_v49  ;;  %v6151_v48 = vld [vmem:[%s6937_s30 + $0x880] ss:$16 sps:$4 sm:$0xff]   ;;  %v6154_v49 = vld [vmem:[%s6937_s30 + $0x888] ss:$16 sps:$4 sm:$0xff]  }
 0x269   : > { %2241 = vmatprep.subr.bf16.mxu0 %v6081_v50  ;;  %2343 = vmatprep.subr.bf16.mxu1 %v6084_v51  ;;  %v6159_v50 = vld [vmem:[%s6937_s30 + $0x8a4] ss:$16 sps:$4 sm:$0xff]   ;;  %v6162_v51 = vld [vmem:[%s6937_s30 + $0x8ac] ss:$16 sps:$4 sm:$0xff]  }
 0x26c   : > { %2242 = vmatpush1.bf16.msra.mxu0 %v6079_v53  ;;  %2344 = vmatpush1.bf16.msra.mxu1 %v6082_v54  ;;  %v6157_v53 = vld [vmem:[%s6937_s30 + $0x8a0] ss:$16 sps:$4 sm:$0xff]   ;;  %v6160_v54 = vld [vmem:[%s6937_s30 + $0x8a8] ss:$16 sps:$4 sm:$0xff]  }
 0x26d   : > { %2243 = vmatprep.subr.bf16.mxu0 %v6087_v55  ;;  %2345 = vmatprep.subr.bf16.mxu1 %v6090_v56  ;;  %v6165_v55 = vld [vmem:[%s6937_s30 + $0x8c4] ss:$16 sps:$4 sm:$0xff]   ;;  %v6168_v56 = vld [vmem:[%s6937_s30 + $0x8cc] ss:$16 sps:$4 sm:$0xff]  }
 0x270   : > { %2244 = vmatpush1.bf16.msra.mxu0 %v6085_v57  ;;  %2346 = vmatpush1.bf16.msra.mxu1 %v6088_v58  ;;  %v6163_v57 = vld [vmem:[%s6937_s30 + $0x8c0] ss:$16 sps:$4 sm:$0xff]   ;;  %v6166_v58 = vld [vmem:[%s6937_s30 + $0x8c8] ss:$16 sps:$4 sm:$0xff]  }
 0x271   : > { %2245 = vmatprep.subr.bf16.mxu0 %v6093_v59  ;;  %2347 = vmatprep.subr.bf16.mxu1 %v6096_v61  ;;  %v6171_v59 = vld [vmem:[%s6937_s30 + $0x8e4] ss:$16 sps:$4 sm:$0xff]   ;;  %v6174_v61 = vld [vmem:[%s6937_s30 + $0x8ec] ss:$16 sps:$4 sm:$0xff]  }
 0x274   : > { %2246 = vmatpush1.bf16.msra.mxu0 %v6091_v62  ;;  %2348 = vmatpush1.bf16.msra.mxu1 %v6094_v63  ;;  %v6169_v62 = vld [vmem:[%s6937_s30 + $0x8e0] ss:$16 sps:$4 sm:$0xff]   ;;  %v6172_v63 = vld [vmem:[%s6937_s30 + $0x8e8] ss:$16 sps:$4 sm:$0xff]  }
 0x275   : > { %2247 = vmatprep.subr.bf16.mxu0 %v6099_v3  ;;  %2349 = vmatprep.subr.bf16.mxu1 %v6102_v2  ;;  %v6177_v3 = vld [vmem:[%s6937_s30 + $0x904] ss:$16 sps:$4 sm:$0xff]   ;;  %v6180_v2 = vld [vmem:[%s6937_s30 + $0x90c] ss:$16 sps:$4 sm:$0xff]  }
 0x278   : > { %2248 = vmatpush1.bf16.msra.mxu0 %v6097_v8  ;;  %2350 = vmatpush1.bf16.msra.mxu1 %v6100_v7  ;;  %v6175_v8 = vld [vmem:[%s6937_s30 + $0x900] ss:$16 sps:$4 sm:$0xff]   ;;  %v6178_v7 = vld [vmem:[%s6937_s30 + $0x908] ss:$16 sps:$4 sm:$0xff]  }
 0x279   : > { %2249 = vmatprep.subr.bf16.mxu0 %v6105_v17  ;;  %2351 = vmatprep.subr.bf16.mxu1 %v6108_v5  ;;  %v6183_v17 = vld [vmem:[%s6937_s30 + $0x924] ss:$16 sps:$4 sm:$0xff]   ;;  %v6186_v5 = vld [vmem:[%s6937_s30 + $0x92c] ss:$16 sps:$4 sm:$0xff]  }
 0x27c   : > { %2250 = vmatpush1.bf16.msra.mxu0 %v6103_v9  ;;  %2352 = vmatpush1.bf16.msra.mxu1 %v6106_v6  ;;  %v6181_v9 = vld [vmem:[%s6937_s30 + $0x920] ss:$16 sps:$4 sm:$0xff]   ;;  %v6184_v6 = vld [vmem:[%s6937_s30 + $0x928] ss:$16 sps:$4 sm:$0xff]  }
 0x27d   : > { %2251 = vmatprep.subr.bf16.mxu0 %v6111_v10  ;;  %2353 = vmatprep.subr.bf16.mxu1 %v6114_v11  ;;  %v6189_v10 = vld [vmem:[%s6937_s30 + $0x944] ss:$16 sps:$4 sm:$0xff]   ;;  %v6192_v11 = vld [vmem:[%s6937_s30 + $0x94c] ss:$16 sps:$4 sm:$0xff]  }
 0x280   : > { %2252 = vmatpush1.bf16.msra.mxu0 %v6109_v12  ;;  %2354 = vmatpush1.bf16.msra.mxu1 %v6112_v13  ;;  %v6187_v12 = vld [vmem:[%s6937_s30 + $0x940] ss:$16 sps:$4 sm:$0xff]   ;;  %v6190_v13 = vld [vmem:[%s6937_s30 + $0x948] ss:$16 sps:$4 sm:$0xff]  }
 0x281   : > { %2253 = vmatprep.subr.bf16.mxu0 %v6117_v14  ;;  %2355 = vmatprep.subr.bf16.mxu1 %v6120_v15  ;;  %v6195_v14 = vld [vmem:[%s6937_s30 + $0x964] ss:$16 sps:$4 sm:$0xff]   ;;  %v6198_v15 = vld [vmem:[%s6937_s30 + $0x96c] ss:$16 sps:$4 sm:$0xff]  }
 0x284   : > { %2254 = vmatpush1.bf16.msra.mxu0 %v6115_v18  ;;  %2356 = vmatpush1.bf16.msra.mxu1 %v6118_v21  ;;  %v6196_v18 = vld [vmem:[%s6937_s30 + $0x968] ss:$16 sps:$4 sm:$0xff]   ;;  %v6201_v21 = vld [vmem:[%s6937_s30 + $0x984] ss:$16 sps:$4 sm:$0xff]  }
 0x285   : > { %2255 = vmatprep.subr.bf16.mxu0 %v6123_v4  ;;  %2357 = vmatprep.subr.bf16.mxu1 %v6126_v25  ;;  %v6204_v4 = vld [vmem:[%s6937_s30 + $0x98c] ss:$16 sps:$4 sm:$0xff]   ;;  %v6199_v25 = vld [vmem:[%s6937_s30 + $0x980] ss:$16 sps:$4 sm:$0xff]  }
 0x288   : > { %2256 = vmatpush1.bf16.msra.mxu0 %v6121_v27  ;;  %2358 = vmatpush1.bf16.msra.mxu1 %v6124_v28  ;;  %v6207_v27 = vld [vmem:[%s6937_s30 + $0x9a4] ss:$16 sps:$4 sm:$0xff]   ;;  %v6210_v28 = vld [vmem:[%s6937_s30 + $0x9ac] ss:$16 sps:$4 sm:$0xff]  }
 0x289   : > { %3202 = vmatprep.subr.bf16.mxu0 %v6129_v0  ;;  %3304 = vmatprep.subr.bf16.mxu1 %v6132_v29  ;;  %v6208_v0 = vld [vmem:[%s6937_s30 + $0x9a8] ss:$16 sps:$4 sm:$0xff]   ;;  %v6213_v29 = vld [vmem:[%s6937_s30 + $0x9c4] ss:$16 sps:$4 sm:$0xff]  }
 0x28b   : > { %2258 = vmatmul.mubr.bf16.vlgmr.msra.gmra.mrb[8].mxu0 %v7225_v1  ;;  %2360 = vmatmul.mubr.bf16.vlgmr.msra.gmra.mrb[8].mxu1 %v7225_v1  ;;  %v6139_v1 = vld [vmem:[%s6937_s30 + $0x840] ss:$16 sps:$4 sm:$0xff]  }
 0x28c   : > { %2267 = vmatprep.mubr.bf16.mxu0 %v1510_v34  ;;  %2369 = vmatprep.mubr.bf16.mxu1 %v1510_v34  ;;  %v6222_v34 = vld [vmem:[%s6937_s30 + $0x9ec] ss:$16 sps:$4 sm:$0xff]  }
 0x28d   : > { %3203 = vmatpush1.bf16.msra.mxu0 %v6127_v32  ;;  %3305 = vmatpush1.bf16.msra.mxu1 %v6130_v33  ;;  %v6214_v32 = vld [vmem:[%s6937_s30 + $0x9c8] ss:$16 sps:$4 sm:$0xff]   ;;  %v6219_v33 = vld [vmem:[%s6937_s30 + $0x9e4] ss:$16 sps:$4 sm:$0xff]  }
 0x28e   : > { %3204 = vmatprep.subr.bf16.mxu0 %v6135_v35  ;;  %3306 = vmatprep.subr.bf16.mxu1 %v6138_v36  ;;  %v6217_v35 = vld [vmem:[%s6937_s30 + $0x9e0] ss:$16 sps:$4 sm:$0xff]   ;;  %v6220_v36 = vld [vmem:[%s6937_s30 + $0x9e8] ss:$16 sps:$4 sm:$0xff]  }
 0x291   : > { %3205 = vmatpush1.bf16.msra.mxu0 %v6133_v60  ;;  %3307 = vmatpush1.bf16.msra.mxu1 %v6136_v37  ;;  %v6228_v60 = vld [vmem:[%s6937_s30 + $0xa0c] ss:$16 sps:$4 sm:$0xff]   ;;  %v4899_v37 = vld [vmem:[%s7204_s24 + $0x4] sm:$0xf] }
 0x292   : > { %3206 = vmatprep.subr.bf16.mxu0 %v6141_v38  ;;  %3308 = vmatprep.subr.bf16.mxu1 %v6144_v39  ;;  %v1517_v38 = vrot.slane %v4899_v37, %v7200_v19  ;;  %v7366_v39 = vrot.slane %v4899_v37, %v7202_v20 }
 0x293   : > { %2268 = vmatmul.mubr.bf16.gmra.mrb[12].mxu0 %v1509_v40  ;;  %2370 = vmatmul.mubr.bf16.gmra.mrb[12].mxu1 %v1509_v40  ;;  %v1521_v40 = vrot.slane %v4899_v37, %v7207_v22 }
 0x295   : > { %3207 = vmatpush1.bf16.msra.mxu0 %v6139_v1  ;;  %3309 = vmatpush1.bf16.msra.mxu1 %v6142_v41  ;;  %v7370_v1 = vrot.slane %v4899_v37, %v7209_v23 }
 0x296   : > { %3208 = vmatprep.subr.bf16.mxu0 %v6147_v42  ;;  %3310 = vmatprep.subr.bf16.mxu1 %v6150_v43 }
 0x299   : > { %3209 = vmatpush1.bf16.msra.mxu0 %v6145_v44  ;;  %3311 = vmatpush1.bf16.msra.mxu1 %v6148_v45 }
 0x29a   : > { %3210 = vmatprep.subr.bf16.mxu0 %v6153_v46  ;;  %3312 = vmatprep.subr.bf16.mxu1 %v6156_v47 }
 0x29d   : > { %3211 = vmatpush1.bf16.msra.mxu0 %v6151_v48  ;;  %3313 = vmatpush1.bf16.msra.mxu1 %v6154_v49 }
 0x29e   : > { %3212 = vmatprep.subr.bf16.mxu0 %v6159_v50  ;;  %3314 = vmatprep.subr.bf16.mxu1 %v6162_v51 }
 0x2a1   : > { %3213 = vmatpush1.bf16.msra.mxu0 %v6157_v53  ;;  %3315 = vmatpush1.bf16.msra.mxu1 %v6160_v54 }
 0x2a2   : > { %3214 = vmatprep.subr.bf16.mxu0 %v6165_v55  ;;  %3316 = vmatprep.subr.bf16.mxu1 %v6168_v56 }
 0x2a5   : > { %3215 = vmatpush1.bf16.msra.mxu0 %v6163_v57  ;;  %3317 = vmatpush1.bf16.msra.mxu1 %v6166_v58 }
 0x2a6   : > { %3216 = vmatprep.subr.bf16.mxu0 %v6171_v59  ;;  %3318 = vmatprep.subr.bf16.mxu1 %v6174_v61 }
 0x2a9   : > { %3217 = vmatpush1.bf16.msra.mxu0 %v6169_v62  ;;  %3319 = vmatpush1.bf16.msra.mxu1 %v6172_v63 }
 0x2aa   : > { %3218 = vmatprep.subr.bf16.mxu0 %v6177_v3  ;;  %3320 = vmatprep.subr.bf16.mxu1 %v6180_v2 }
 0x2ad   : > { %3219 = vmatpush1.bf16.msra.mxu0 %v6175_v8  ;;  %3321 = vmatpush1.bf16.msra.mxu1 %v6178_v7 }
 0x2ae   : > { %3220 = vmatprep.subr.bf16.mxu0 %v6183_v17  ;;  %3322 = vmatprep.subr.bf16.mxu1 %v6186_v5 }
 0x2b1   : > { %3221 = vmatpush1.bf16.msra.mxu0 %v6181_v9  ;;  %3323 = vmatpush1.bf16.msra.mxu1 %v6184_v6 }
 0x2b2   : > { %3222 = vmatprep.subr.bf16.mxu0 %v6189_v10  ;;  %3324 = vmatprep.subr.bf16.mxu1 %v6192_v11 }
 0x2b5   : > { %3223 = vmatpush1.bf16.msra.mxu0 %v6187_v12  ;;  %3325 = vmatpush1.bf16.msra.mxu1 %v6190_v13 }
 0x2b6   : > { %3224 = vmatprep.subr.bf16.mxu0 %v6195_v14  ;;  %3326 = vmatprep.subr.bf16.mxu1 %v6198_v15 }
 0x2b9   : > { %3225 = vmatpush1.bf16.msra.mxu0 %v6193_v16  ;;  %3327 = vmatpush1.bf16.msra.mxu1 %v6196_v18 }
 0x2ba   : > { %3226 = vmatprep.subr.bf16.mxu0 %v6201_v21  ;;  %3328 = vmatprep.subr.bf16.mxu1 %v6204_v4 }
 0x2bd   : > { %3227 = vmatpush1.bf16.msra.mxu0 %v6199_v25  ;;  %3329 = vmatpush1.bf16.msra.mxu1 %v6202_v26  ;;  %v6223_v25 = vld [vmem:[%s6937_s30 + $0xa00] ss:$16 sps:$4 sm:$0xff]  }
 0x2be   : > { %3228 = vmatprep.subr.bf16.mxu0 %v6207_v27  ;;  %3330 = vmatprep.subr.bf16.mxu1 %v6210_v28 }
 0x2c1   : > { %3229 = vmatpush1.bf16.msra.mxu0 %v6205_v52  ;;  %3331 = vmatpush1.bf16.msra.mxu1 %v6208_v0  ;;  %v6226_v0 = vld [vmem:[%s6937_s30 + $0xa08] ss:$16 sps:$4 sm:$0xff]  }
 0x2c2   : > { %3230 = vmatprep.subr.bf16.mxu0 %v6213_v29  ;;  %3332 = vmatprep.subr.bf16.mxu1 %v6216_v30  ;;  %v6231_v29 = vld [vmem:[%s6937_s30 + $0xa24] ss:$16 sps:$4 sm:$0xff]  }
 0x2c5   : > { %3231 = vmatpush1.bf16.msra.mxu0 %v6211_v31  ;;  %3333 = vmatpush1.bf16.msra.mxu1 %v6214_v32 }
 0x2c6   : > { %3232 = vmatprep.subr.bf16.mxu0 %v6219_v33  ;;  %3334 = vmatprep.subr.bf16.mxu1 %v6222_v34  ;;  %v6234_v34 = vld [vmem:[%s6937_s30 + $0xa2c] ss:$16 sps:$4 sm:$0xff]  }
 0x2c9   : > { %3233 = vmatpush1.bf16.msra.mxu0 %v6217_v35  ;;  %3335 = vmatpush1.bf16.msra.mxu1 %v6220_v36 }
 0x2ca   : > { %3253 = vmatprep.subr.bf16.mxu0 %v6225_v24  ;;  %3355 = vmatprep.subr.bf16.mxu1 %v6228_v60  ;;  %v6229_v24 = vld [vmem:[%s6937_s30 + $0xa20] ss:$16 sps:$4 sm:$0xff]   ;;  %v6232_v60 = vld [vmem:[%s6937_s30 + $0xa28] ss:$16 sps:$4 sm:$0xff]  }
 0x35e   : > { %v2259_v41 = vpop.f32.mrb[8].mxu0  ;;  %v2361_v42 = vpop.f32.mrb[8].mxu1 }
 0x35f   : > { %v5559_v43 = vadd.f32 %v2259_v41, %v1517_v38  ;;  %v5565_v44 = vadd.f32 %v2361_v42, %v7366_v39  ;;  %v2261_v45 = vpop.f32.mrb[9].mxu0  ;;  %v2363_v46 = vpop.f32.mrb[9].mxu1  ;;  %v6240_v41 = vld [vmem:[%s6937_s30 + $0xa4c] ss:$16 sps:$4 sm:$0xff]   ;;  %v6235_v42 = vld [vmem:[%s6937_s30 + $0xa40] ss:$16 sps:$4 sm:$0xff]  }
 0x360   : > { %v5560_v47 = vadd.f32 %v2261_v45, %v1521_v40  ;;  %v5566_v48 = vadd.f32 %v2363_v46, %v7370_v1  ;;  %v2263_v49 = vpop.f32.mrb[10].mxu0  ;;  %v2365_v50 = vpop.f32.mrb[10].mxu1  ;;  %v6243_v45 = vld [vmem:[%s6937_s30 + $0xa64] ss:$16 sps:$4 sm:$0xff]   ;;  %v6246_v46 = vld [vmem:[%s6937_s30 + $0xa6c] ss:$16 sps:$4 sm:$0xff]  }
 0x361   : > { %v2378_v51 = vmul.f32 0.2, %v5559_v43  ;;  %v2380_v53 = vmul.f32 0.2, %v5565_v44  ;;  %v5561_v54 = vadd.f32 %v2263_v49, %v1517_v38  ;;  %v5567_v55 = vadd.f32 %v2365_v50, %v7366_v39  ;;  %v2265_v56 = vpop.f32.mrb[11].mxu0  ;;  %v2367_v57 = vpop.f32.mrb[11].mxu1 }
 0x362   : > { %v2379_v58 = vmul.f32 0.2, %v5560_v47  ;;  %v2381_v59 = vmul.f32 0.2, %v5566_v48  ;;  %v5562_v61 = vadd.f32 %v2265_v56, %v1521_v40  ;;  %v5568_v62 = vadd.f32 %v2367_v57, %v7370_v1  ;;  %v6249_v49 = vld [vmem:[%s6937_s30 + $0xa84] ss:$16 sps:$4 sm:$0xff]  }
 0x363   : > { %v2382_v63 = vmul.f32 0.2, %v5561_v54  ;;  %v2384_v3 = vmul.f32 0.2, %v5567_v55  ;;  %v2390_v7 = vmax.f32 %v5559_v43, %v2378_v51  ;;  %v2392_v17 = vmax.f32 %v5565_v44, %v2380_v53  ;;  %v6238_v43 = vld [vmem:[%s6937_s30 + $0xa48] ss:$16 sps:$4 sm:$0xff]  }
 0x364   : > { %v2383_v2 = vmul.f32 0.2, %v5562_v61  ;;  %v2385_v8 = vmul.f32 0.2, %v5568_v62  ;;  %v2391_v6 = vmax.f32 %v5560_v47, %v2379_v58  ;;  %v2393_v10 = vmax.f32 %v5566_v48, %v2381_v59  ;;  %v6241_v47 = vld [vmem:[%s6937_s30 + $0xa60] ss:$16 sps:$4 sm:$0xff]  }
 0x365   : > { %v2394_v5 = vmax.f32 %v5561_v54, %v2382_v63  ;;  %v2396_v9 = vmax.f32 %v5567_v55, %v2384_v3  ;;  %v6244_v48 = vld [vmem:[%s6937_s30 + $0xa68] ss:$16 sps:$4 sm:$0xff]   ;;  %v6252_v50 = vld [vmem:[%s6937_s30 + $0xa8c] ss:$16 sps:$4 sm:$0xff]   ;;  %v6247_v51 = vld [vmem:[%s6937_s30 + $0xa80] ss:$16 sps:$4 sm:$0xff]  }
 0x366   : > { %v2395_v11 = vmax.f32 %v5562_v61, %v2383_v2  ;;  %v2397_v12 = vmax.f32 %v5568_v62, %v2385_v8  ;;  %v2269_v13 = vpop.f32.mrb[12].mxu0  ;;  %v7376_v14 = vpop.f32.mrb[12].mxu1  ;;  %v6250_v53 = vld [vmem:[%s6937_s30 + $0xa88] ss:$16 sps:$4 sm:$0xff]   ;;  %v6255_v54 = vld [vmem:[%s6937_s30 + $0xaa4] ss:$16 sps:$4 sm:$0xff]  }
 0x367   : > { %v2531_v15 = vpack.c.bf16 %v2394_v5, %v2390_v7  ;;  %v7378_v16 = vpack.c.bf16 %v2396_v9, %v2392_v17  ;;  %v5563_v18 = vadd.f32 %v2269_v13, %v1517_v38  ;;  %v2271_v21 = vpop.f32.mrb[13].mxu0  ;;  %v7380_v4 = vpop.f32.mrb[13].mxu1  ;;  %v6258_v55 = vld [vmem:[%s6937_s30 + $0xaac] ss:$16 sps:$4 sm:$0xff]   ;;  %v6253_v56 = vld [vmem:[%s6937_s30 + $0xaa0] ss:$16 sps:$4 sm:$0xff]  }
 0x368   : > { %v5564_v26 = vadd.f32 %v2271_v21, %v1521_v40  ;;  %v2273_v27 = vpop.f32.mrb[14].mxu0  ;;  %v2375_v28 = vpop.f32.mrb[14].mxu1  ;;  %v2532_v52 = vpack.c.bf16 %v2395_v11, %v2391_v6  ;;  %v2534_v30 = vpack.c.bf16 %v2397_v12, %v2393_v10  ;;  %v6237_v40 = vld [vmem:[%s6937_s30 + $0xa44] ss:$16 sps:$4 sm:$0xff]   ;;  %v6256_v57 = vld [vmem:[%s6937_s30 + $0xaa8] ss:$16 sps:$4 sm:$0xff]  }
 0x369   : > { %v2386_v31 = vmul.f32 0.2, %v5563_v18  ;;  %v2274_v32 = vpop.f32.mrb[15].mxu0  ;;  %v2376_v33 = vpop.f32.mrb[15].mxu1  ;;  %v6261_v58 = vld [vmem:[%s6937_s30 + $0xac4] ss:$16 sps:$4 sm:$0xff]  }
 0x36a   : > { %v2387_v35 = vmul.f32 0.2, %v5564_v26  ;;  %3234 = vmatprep.mubr.bf16.mxu0 %v2532_v52  ;;  %3336 = vmatprep.mubr.bf16.mxu1 %v2532_v52  ;;  %v6264_v59 = vld [vmem:[%s6937_s30 + $0xacc] ss:$16 sps:$4 sm:$0xff]   ;;  %v6259_v61 = vld [vmem:[%s6937_s30 + $0xac0] ss:$16 sps:$4 sm:$0xff]  }
 0x36b   : > { %3235 = vmatmul.mubr.bf16.vlgmr.msra.gmra.mrb[16].mxu0 %v2531_v15  ;;  %3337 = vmatmul.mubr.bf16.vlgmr.msra.gmra.mrb[16].mxu1 %v2531_v15  ;;  %v2398_v37 = vmax.f32 %v5563_v18, %v2386_v31  ;;  %v6262_v62 = vld [vmem:[%s6937_s30 + $0xac8] ss:$16 sps:$4 sm:$0xff]   ;;  %v6267_v63 = vld [vmem:[%s6937_s30 + $0xae4] ss:$16 sps:$4 sm:$0xff]   ;;  %v6270_v3 = vld [vmem:[%s6937_s30 + $0xaec] ss:$16 sps:$4 sm:$0xff]  }
 0x36c   : > { %v2399_v36 = vmax.f32 %v5564_v26, %v2387_v35  ;;  %3254 = vmatpush1.bf16.msra.mxu0 %v6223_v25  ;;  %3356 = vmatpush1.bf16.msra.mxu1 %v6226_v0  ;;  %v6265_v2 = vld [vmem:[%s6937_s30 + $0xae0] ss:$16 sps:$4 sm:$0xff]   ;;  %v6268_v8 = vld [vmem:[%s6937_s30 + $0xae8] ss:$16 sps:$4 sm:$0xff]   ;;  %v6273_v7 = vld [vmem:[%s6937_s30 + $0xb04] ss:$16 sps:$4 sm:$0xff]  }
 0x36d   : > { %3255 = vmatprep.subr.bf16.mxu0 %v6231_v29  ;;  %3357 = vmatprep.subr.bf16.mxu1 %v6234_v34  ;;  %v2535_v44 = vpack.c.bf16 %v2398_v37, %v2398_v37  ;;  %v6276_v17 = vld [vmem:[%s6937_s30 + $0xb0c] ss:$16 sps:$4 sm:$0xff]   ;;  %v6271_v5 = vld [vmem:[%s6937_s30 + $0xb00] ss:$16 sps:$4 sm:$0xff]   ;;  %v6274_v9 = vld [vmem:[%s6937_s30 + $0xb08] ss:$16 sps:$4 sm:$0xff]  }
 0x36e   : > { %v2536_v38 = vpack.c.bf16 %v2399_v36, %v2399_v36  ;;  %v6279_v6 = vld [vmem:[%s6937_s30 + $0xb24] ss:$16 sps:$4 sm:$0xff]   ;;  %v6282_v10 = vld [vmem:[%s6937_s30 + $0xb2c] ss:$16 sps:$4 sm:$0xff]   ;;  %v6277_v11 = vld [vmem:[%s6937_s30 + $0xb20] ss:$16 sps:$4 sm:$0xff]  }
 0x36f   : > { %v6280_v12 = vld [vmem:[%s6937_s30 + $0xb28] ss:$16 sps:$4 sm:$0xff]   ;;  %v6285_v13 = vld [vmem:[%s6937_s30 + $0xb44] ss:$16 sps:$4 sm:$0xff]   ;;  %v6288_v15 = vld [vmem:[%s6937_s30 + $0xb4c] ss:$16 sps:$4 sm:$0xff]  }
 0x370   : > { %3256 = vmatpush1.bf16.msra.mxu0 %v6229_v24  ;;  %3358 = vmatpush1.bf16.msra.mxu1 %v6232_v60  ;;  %v6283_v18 = vld [vmem:[%s6937_s30 + $0xb40] ss:$16 sps:$4 sm:$0xff]   ;;  %v6286_v21 = vld [vmem:[%s6937_s30 + $0xb48] ss:$16 sps:$4 sm:$0xff]   ;;  %v6291_v25 = vld [vmem:[%s6937_s30 + $0xb64] ss:$16 sps:$4 sm:$0xff]   ;;  %v5570_v24 = vadd.f32 %v7380_v4, %v7370_v1  ;;  %v5569_v1 = vadd.f32 %v7376_v14, %v7366_v39 }
 0x371   : > { %3244 = vmatprep.mubr.bf16.mxu0 %v2536_v38  ;;  %3346 = vmatprep.mubr.bf16.mxu1 %v2536_v38  ;;  %v6294_v26 = vld [vmem:[%s6937_s30 + $0xb6c] ss:$16 sps:$4 sm:$0xff]   ;;  %v6289_v27 = vld [vmem:[%s6937_s30 + $0xb60] ss:$16 sps:$4 sm:$0xff]   ;;  %v6292_v28 = vld [vmem:[%s6937_s30 + $0xb68] ss:$16 sps:$4 sm:$0xff]  }
 0x372   : > { %3257 = vmatprep.subr.bf16.mxu0 %v6237_v40  ;;  %3359 = vmatprep.subr.bf16.mxu1 %v6240_v41  ;;  %v6297_v52 = vld [vmem:[%s6937_s30 + $0xb84] ss:$16 sps:$4 sm:$0xff]   ;;  %v6300_v0 = vld [vmem:[%s6937_s30 + $0xb8c] ss:$16 sps:$4 sm:$0xff]   ;;  %v6295_v29 = vld [vmem:[%s6937_s30 + $0xb80] ss:$16 sps:$4 sm:$0xff]  }
 0x373   : > { %3245 = vmatmul.mubr.bf16.gmra.mrb[20].mxu0 %v2535_v44  ;;  %3347 = vmatmul.mubr.bf16.gmra.mrb[20].mxu1 %v2535_v44  ;;  %v6303_v31 = vld [vmem:[%s6937_s30 + $0xba4] ss:$16 sps:$4 sm:$0xff]   ;;  %v6306_v32 = vld [vmem:[%s6937_s30 + $0xbac] ss:$16 sps:$4 sm:$0xff]   ;;  %v6301_v33 = vld [vmem:[%s6937_s30 + $0xba0] ss:$16 sps:$4 sm:$0xff]  }
 0x374   : > { %3258 = vmatpush1.bf16.msra.mxu0 %v6235_v42  ;;  %3360 = vmatpush1.bf16.msra.mxu1 %v6238_v43  ;;  %v6304_v34 = vld [vmem:[%s6937_s30 + $0xba8] ss:$16 sps:$4 sm:$0xff]   ;;  %v6309_v35 = vld [vmem:[%s6937_s30 + $0xbc4] ss:$16 sps:$4 sm:$0xff]   ;;  %v6312_v36 = vld [vmem:[%s6937_s30 + $0xbcc] ss:$16 sps:$4 sm:$0xff]  }
 0x375   : > { %3285 = vmatprep.mubr.bf16.mxu0 %v2534_v30  ;;  %3387 = vmatprep.mubr.bf16.mxu1 %v2534_v30  ;;  %v6298_v30 = vld [vmem:[%s6937_s30 + $0xb88] ss:$16 sps:$4 sm:$0xff]   ;;  %v6307_v60 = vld [vmem:[%s6937_s30 + $0xbc0] ss:$16 sps:$4 sm:$0xff]   ;;  %v6315_v38 = vld [vmem:[%s6937_s30 + $0xbe4] ss:$16 sps:$4 sm:$0xff]  }
 0x376   : > { %3259 = vmatprep.subr.bf16.mxu0 %v6243_v45  ;;  %3361 = vmatprep.subr.bf16.mxu1 %v6246_v46  ;;  %v6310_v37 = vld [vmem:[%s6937_s30 + $0xbc8] ss:$16 sps:$4 sm:$0xff]   ;;  %v6318_v40 = vld [vmem:[%s6937_s30 + $0xbec] ss:$16 sps:$4 sm:$0xff]   ;;  %v2389_v41 = vmul.f32 0.2, %v5570_v24 }
 0x377   : > { %v6313_v42 = vld [vmem:[%s6937_s30 + $0xbe0] ss:$16 sps:$4 sm:$0xff]   ;;  %v6316_v43 = vld [vmem:[%s6937_s30 + $0xbe8] ss:$16 sps:$4 sm:$0xff]   ;;  %v6321_v4 = vld [vmem:[%s6937_s30 + $0xc04] ss:$16 sps:$4 sm:$0xff]  }
 0x378   : > { %3260 = vmatpush1.bf16.msra.mxu0 %v6241_v47  ;;  %3362 = vmatpush1.bf16.msra.mxu1 %v6244_v48  ;;  %v6324_v44 = vld [vmem:[%s6937_s30 + $0xc0c] ss:$16 sps:$4 sm:$0xff]   ;;  %v2401_v45 = vmax.f32 %v5570_v24, %v2389_v41  ;;  %v2388_v46 = vmul.f32 0.2, %v5569_v1  ;;  %v6319_v47 = vld [vmem:[%s6937_s30 + $0xc00] ss:$16 sps:$4 sm:$0xff]  }
 0x379   : > { %3261 = vmatprep.subr.bf16.mxu0 %v6249_v49  ;;  %3363 = vmatprep.subr.bf16.mxu1 %v6252_v50  ;;  %v6322_v48 = vld [vmem:[%s6937_s30 + $0xc08] ss:$16 sps:$4 sm:$0xff]   ;;  %v6327_v50 = vld [vmem:[%s6937_s30 + $0xc24] ss:$16 sps:$4 sm:$0xff]   ;;  %v6325_v14 = vld [vmem:[%s6937_s30 + $0xc20] ss:$16 sps:$4 sm:$0xff]  }
 0x37a   : > { %v2538_v49 = vpack.c.bf16 %v2401_v45, %v2401_v45  ;;  %v2400_v39 = vmax.f32 %v5569_v1, %v2388_v46  ;;  %v6385_v24 = vld [vmem:[%s6937_s30 + $0xd60] ss:$16 sps:$4 sm:$0xff]   ;;  %v6394_v41 = vld [vmem:[%s6937_s30 + $0xd88] ss:$16 sps:$4 sm:$0xff]   ;;  %v6408_v45 = vld [vmem:[%s6937_s30 + $0xdcc] ss:$16 sps:$4 sm:$0xff]  }
 0x37b   : > { %v6397_v1 = vld [vmem:[%s6937_s30 + $0xda0] ss:$16 sps:$4 sm:$0xff]  }
 0x37c   : > { %3262 = vmatpush1.bf16.msra.mxu0 %v6247_v51  ;;  %3364 = vmatpush1.bf16.msra.mxu1 %v6250_v53  ;;  %v6330_v51 = vld [vmem:[%s6937_s30 + $0xc2c] ss:$16 sps:$4 sm:$0xff]   ;;  %v6328_v53 = vld [vmem:[%s6937_s30 + $0xc28] ss:$16 sps:$4 sm:$0xff]   ;;  %v6403_v46 = vld [vmem:[%s6937_s30 + $0xdc0] ss:$16 sps:$4 sm:$0xff]  }
 0x37d   : > { %3263 = vmatprep.subr.bf16.mxu0 %v6255_v54  ;;  %3365 = vmatprep.subr.bf16.mxu1 %v6258_v55  ;;  %v6333_v54 = vld [vmem:[%s6937_s30 + $0xc44] ss:$16 sps:$4 sm:$0xff]   ;;  %v6336_v55 = vld [vmem:[%s6937_s30 + $0xc4c] ss:$16 sps:$4 sm:$0xff]  }
 0x380   : > { %3264 = vmatpush1.bf16.msra.mxu0 %v6253_v56  ;;  %3366 = vmatpush1.bf16.msra.mxu1 %v6256_v57  ;;  %v2537_v56 = vpack.c.bf16 %v2400_v39, %v2400_v39  ;;  %v6334_v57 = vld [vmem:[%s6937_s30 + $0xc48] ss:$16 sps:$4 sm:$0xff]   ;;  %v6417_v39 = vld [vmem:[%s6937_s30 + $0xe04] ss:$16 sps:$4 sm:$0xff]  }
 0x381   : > { %3265 = vmatprep.subr.bf16.mxu0 %v6261_v58  ;;  %3367 = vmatprep.subr.bf16.mxu1 %v6264_v59  ;;  %v6339_v58 = vld [vmem:[%s6937_s30 + $0xc64] ss:$16 sps:$4 sm:$0xff]   ;;  %v6342_v59 = vld [vmem:[%s6937_s30 + $0xc6c] ss:$16 sps:$4 sm:$0xff]  }
 0x384   : > { %3266 = vmatpush1.bf16.msra.mxu0 %v6259_v61  ;;  %3368 = vmatpush1.bf16.msra.mxu1 %v6262_v62  ;;  %v6337_v61 = vld [vmem:[%s6937_s30 + $0xc60] ss:$16 sps:$4 sm:$0xff]   ;;  %v6340_v62 = vld [vmem:[%s6937_s30 + $0xc68] ss:$16 sps:$4 sm:$0xff]  }
 0x385   : > { %3267 = vmatprep.subr.bf16.mxu0 %v6267_v63  ;;  %3369 = vmatprep.subr.bf16.mxu1 %v6270_v3  ;;  %v6345_v63 = vld [vmem:[%s6937_s30 + $0xc84] ss:$16 sps:$4 sm:$0xff]   ;;  %v6348_v3 = vld [vmem:[%s6937_s30 + $0xc8c] ss:$16 sps:$4 sm:$0xff]  }
 0x388   : > { %3268 = vmatpush1.bf16.msra.mxu0 %v6265_v2  ;;  %3370 = vmatpush1.bf16.msra.mxu1 %v6268_v8  ;;  %v6343_v2 = vld [vmem:[%s6937_s30 + $0xc80] ss:$16 sps:$4 sm:$0xff]   ;;  %v6346_v8 = vld [vmem:[%s6937_s30 + $0xc88] ss:$16 sps:$4 sm:$0xff]  }
 0x389   : > { %3269 = vmatprep.subr.bf16.mxu0 %v6273_v7  ;;  %3371 = vmatprep.subr.bf16.mxu1 %v6276_v17  ;;  %v6351_v7 = vld [vmem:[%s6937_s30 + $0xca4] ss:$16 sps:$4 sm:$0xff]   ;;  %v6354_v17 = vld [vmem:[%s6937_s30 + $0xcac] ss:$16 sps:$4 sm:$0xff]  }
 0x38c   : > { %3270 = vmatpush1.bf16.msra.mxu0 %v6271_v5  ;;  %3372 = vmatpush1.bf16.msra.mxu1 %v6274_v9  ;;  %v6349_v5 = vld [vmem:[%s6937_s30 + $0xca0] ss:$16 sps:$4 sm:$0xff]   ;;  %v6352_v9 = vld [vmem:[%s6937_s30 + $0xca8] ss:$16 sps:$4 sm:$0xff]  }
 0x38d   : > { %3271 = vmatprep.subr.bf16.mxu0 %v6279_v6  ;;  %3373 = vmatprep.subr.bf16.mxu1 %v6282_v10  ;;  %v6357_v6 = vld [vmem:[%s6937_s30 + $0xcc4] ss:$16 sps:$4 sm:$0xff]   ;;  %v6360_v10 = vld [vmem:[%s6937_s30 + $0xccc] ss:$16 sps:$4 sm:$0xff]  }
 0x390   : > { %3272 = vmatpush1.bf16.msra.mxu0 %v6277_v11  ;;  %3374 = vmatpush1.bf16.msra.mxu1 %v6280_v12  ;;  %v6355_v11 = vld [vmem:[%s6937_s30 + $0xcc0] ss:$16 sps:$4 sm:$0xff]   ;;  %v6358_v12 = vld [vmem:[%s6937_s30 + $0xcc8] ss:$16 sps:$4 sm:$0xff]  }
 0x391   : > { %3273 = vmatprep.subr.bf16.mxu0 %v6285_v13  ;;  %3375 = vmatprep.subr.bf16.mxu1 %v6288_v15  ;;  %v6363_v13 = vld [vmem:[%s6937_s30 + $0xce4] ss:$16 sps:$4 sm:$0xff]   ;;  %v6366_v15 = vld [vmem:[%s6937_s30 + $0xcec] ss:$16 sps:$4 sm:$0xff]  }
 0x394   : > { %3274 = vmatpush1.bf16.msra.mxu0 %v6283_v18  ;;  %3376 = vmatpush1.bf16.msra.mxu1 %v6286_v21  ;;  %v6361_v18 = vld [vmem:[%s6937_s30 + $0xce0] ss:$16 sps:$4 sm:$0xff]   ;;  %v6364_v21 = vld [vmem:[%s6937_s30 + $0xce8] ss:$16 sps:$4 sm:$0xff]  }
 0x395   : > { %3275 = vmatprep.subr.bf16.mxu0 %v6291_v25  ;;  %3377 = vmatprep.subr.bf16.mxu1 %v6294_v26  ;;  %v6369_v25 = vld [vmem:[%s6937_s30 + $0xd04] ss:$16 sps:$4 sm:$0xff]   ;;  %v6372_v26 = vld [vmem:[%s6937_s30 + $0xd0c] ss:$16 sps:$4 sm:$0xff]  }
 0x398   : > { %3276 = vmatpush1.bf16.msra.mxu0 %v6289_v27  ;;  %3378 = vmatpush1.bf16.msra.mxu1 %v6292_v28  ;;  %v6367_v27 = vld [vmem:[%s6937_s30 + $0xd00] ss:$16 sps:$4 sm:$0xff]   ;;  %v6370_v28 = vld [vmem:[%s6937_s30 + $0xd08] ss:$16 sps:$4 sm:$0xff]  }
 0x399   : > { %3277 = vmatprep.subr.bf16.mxu0 %v6297_v52  ;;  %3379 = vmatprep.subr.bf16.mxu1 %v6300_v0  ;;  %v6375_v52 = vld [vmem:[%s6937_s30 + $0xd24] ss:$16 sps:$4 sm:$0xff]   ;;  %v6378_v0 = vld [vmem:[%s6937_s30 + $0xd2c] ss:$16 sps:$4 sm:$0xff]  }
 0x39c   : > { %3278 = vmatpush1.bf16.msra.mxu0 %v6295_v29  ;;  %3380 = vmatpush1.bf16.msra.mxu1 %v6298_v30  ;;  %v6373_v29 = vld [vmem:[%s6937_s30 + $0xd20] ss:$16 sps:$4 sm:$0xff]   ;;  %v6376_v30 = vld [vmem:[%s6937_s30 + $0xd28] ss:$16 sps:$4 sm:$0xff]  }
 0x39d   : > { %3279 = vmatprep.subr.bf16.mxu0 %v6303_v31  ;;  %3381 = vmatprep.subr.bf16.mxu1 %v6306_v32  ;;  %v6381_v31 = vld [vmem:[%s6937_s30 + $0xd44] ss:$16 sps:$4 sm:$0xff]   ;;  %v6384_v32 = vld [vmem:[%s6937_s30 + $0xd4c] ss:$16 sps:$4 sm:$0xff]  }
 0x3a0   : > { %3280 = vmatpush1.bf16.msra.mxu0 %v6301_v33  ;;  %3382 = vmatpush1.bf16.msra.mxu1 %v6304_v34  ;;  %v6379_v33 = vld [vmem:[%s6937_s30 + $0xd40] ss:$16 sps:$4 sm:$0xff]   ;;  %v6382_v34 = vld [vmem:[%s6937_s30 + $0xd48] ss:$16 sps:$4 sm:$0xff]  }
 0x3a1   : > { %3281 = vmatprep.subr.bf16.mxu0 %v6309_v35  ;;  %3383 = vmatprep.subr.bf16.mxu1 %v6312_v36  ;;  %v6387_v35 = vld [vmem:[%s6937_s30 + $0xd64] ss:$16 sps:$4 sm:$0xff]   ;;  %v6390_v36 = vld [vmem:[%s6937_s30 + $0xd6c] ss:$16 sps:$4 sm:$0xff]  }
 0x3a4   : > { %3282 = vmatpush1.bf16.msra.mxu0 %v6307_v60  ;;  %3384 = vmatpush1.bf16.msra.mxu1 %v6310_v37  ;;  %v6388_v60 = vld [vmem:[%s6937_s30 + $0xd68] ss:$16 sps:$4 sm:$0xff]   ;;  %v6393_v37 = vld [vmem:[%s6937_s30 + $0xd84] ss:$16 sps:$4 sm:$0xff]  }
 0x3a5   : > { %3283 = vmatprep.subr.bf16.mxu0 %v6315_v38  ;;  %3385 = vmatprep.subr.bf16.mxu1 %v6318_v40  ;;  %v6396_v38 = vld [vmem:[%s6937_s30 + $0xd8c] ss:$16 sps:$4 sm:$0xff]   ;;  %v6391_v40 = vld [vmem:[%s6937_s30 + $0xd80] ss:$16 sps:$4 sm:$0xff]  }
 0x3a8   : > { %3284 = vmatpush1.bf16.msra.mxu0 %v6313_v42  ;;  %3386 = vmatpush1.bf16.msra.mxu1 %v6316_v43  ;;  %v6399_v42 = vld [vmem:[%s6937_s30 + $0xda4] ss:$16 sps:$4 sm:$0xff]   ;;  %v6402_v43 = vld [vmem:[%s6937_s30 + $0xdac] ss:$16 sps:$4 sm:$0xff]  }
 0x3a9   : > { %4230 = vmatprep.subr.bf16.mxu0 %v6321_v4  ;;  %4332 = vmatprep.subr.bf16.mxu1 %v6324_v44  ;;  %v6400_v4 = vld [vmem:[%s6937_s30 + $0xda8] ss:$16 sps:$4 sm:$0xff]   ;;  %v6405_v44 = vld [vmem:[%s6937_s30 + $0xdc4] ss:$16 sps:$4 sm:$0xff]  }
 0x3ab   : > { %3286 = vmatmul.mubr.bf16.vlgmr.msra.gmra.mrb[16].mxu0 %v7378_v16  ;;  %3388 = vmatmul.mubr.bf16.vlgmr.msra.gmra.mrb[16].mxu1 %v7378_v16  ;;  %v6331_v16 = vld [vmem:[%s6937_s30 + $0xc40] ss:$16 sps:$4 sm:$0xff]  }
 0x3ac   : > { %3295 = vmatprep.mubr.bf16.mxu0 %v2538_v49  ;;  %3397 = vmatprep.mubr.bf16.mxu1 %v2538_v49  ;;  %v6414_v49 = vld [vmem:[%s6937_s30 + $0xdec] ss:$16 sps:$4 sm:$0xff]  }
 0x3ad   : > { %4231 = vmatpush1.bf16.msra.mxu0 %v6319_v47  ;;  %4333 = vmatpush1.bf16.msra.mxu1 %v6322_v48  ;;  %v6406_v47 = vld [vmem:[%s6937_s30 + $0xdc8] ss:$16 sps:$4 sm:$0xff]   ;;  %v6411_v48 = vld [vmem:[%s6937_s30 + $0xde4] ss:$16 sps:$4 sm:$0xff]  }
 0x3ae   : > { %4232 = vmatprep.subr.bf16.mxu0 %v6327_v50  ;;  %4334 = vmatprep.subr.bf16.mxu1 %v6330_v51  ;;  %v6409_v50 = vld [vmem:[%s6937_s30 + $0xde0] ss:$16 sps:$4 sm:$0xff]   ;;  %v6412_v51 = vld [vmem:[%s6937_s30 + $0xde8] ss:$16 sps:$4 sm:$0xff]  }
 0x3b1   : > { %4233 = vmatpush1.bf16.msra.mxu0 %v6325_v14  ;;  %4335 = vmatpush1.bf16.msra.mxu1 %v6328_v53  ;;  %v6420_v14 = vld [vmem:[%s6937_s30 + $0xe0c] ss:$16 sps:$4 sm:$0xff]   ;;  %v5156_v53 = vld [vmem:[%s7204_s24 + $0x8] sm:$0xf] }
 0x3b2   : > { %4234 = vmatprep.subr.bf16.mxu0 %v6333_v54  ;;  %4336 = vmatprep.subr.bf16.mxu1 %v6336_v55  ;;  %v2545_v54 = vrot.slane %v5156_v53, %v7200_v19  ;;  %v7519_v55 = vrot.slane %v5156_v53, %v7202_v20 }
 0x3b3   : > { %3296 = vmatmul.mubr.bf16.gmra.mrb[20].mxu0 %v2537_v56  ;;  %3398 = vmatmul.mubr.bf16.gmra.mrb[20].mxu1 %v2537_v56  ;;  %v2549_v56 = vrot.slane %v5156_v53, %v7207_v22 }
 0x3b5   : > { %4235 = vmatpush1.bf16.msra.mxu0 %v6331_v16  ;;  %4337 = vmatpush1.bf16.msra.mxu1 %v6334_v57  ;;  %v7523_v16 = vrot.slane %v5156_v53, %v7209_v23 }
 0x3b6   : > { %4236 = vmatprep.subr.bf16.mxu0 %v6339_v58  ;;  %4338 = vmatprep.subr.bf16.mxu1 %v6342_v59 }
 0x3b9   : > { %4237 = vmatpush1.bf16.msra.mxu0 %v6337_v61  ;;  %4339 = vmatpush1.bf16.msra.mxu1 %v6340_v62 }
 0x3ba   : > { %4238 = vmatprep.subr.bf16.mxu0 %v6345_v63  ;;  %4340 = vmatprep.subr.bf16.mxu1 %v6348_v3 }
 0x3bd   : > { %4239 = vmatpush1.bf16.msra.mxu0 %v6343_v2  ;;  %4341 = vmatpush1.bf16.msra.mxu1 %v6346_v8 }
 0x3be   : > { %4240 = vmatprep.subr.bf16.mxu0 %v6351_v7  ;;  %4342 = vmatprep.subr.bf16.mxu1 %v6354_v17 }
 0x3c1   : > { %4241 = vmatpush1.bf16.msra.mxu0 %v6349_v5  ;;  %4343 = vmatpush1.bf16.msra.mxu1 %v6352_v9 }
 0x3c2   : > { %4242 = vmatprep.subr.bf16.mxu0 %v6357_v6  ;;  %4344 = vmatprep.subr.bf16.mxu1 %v6360_v10 }
 0x3c5   : > { %4243 = vmatpush1.bf16.msra.mxu0 %v6355_v11  ;;  %4345 = vmatpush1.bf16.msra.mxu1 %v6358_v12 }
 0x3c6   : > { %4244 = vmatprep.subr.bf16.mxu0 %v6363_v13  ;;  %4346 = vmatprep.subr.bf16.mxu1 %v6366_v15 }
 0x3c9   : > { %4245 = vmatpush1.bf16.msra.mxu0 %v6361_v18  ;;  %4347 = vmatpush1.bf16.msra.mxu1 %v6364_v21 }
 0x3ca   : > { %4246 = vmatprep.subr.bf16.mxu0 %v6369_v25  ;;  %4348 = vmatprep.subr.bf16.mxu1 %v6372_v26 }
 0x3cd   : > { %4247 = vmatpush1.bf16.msra.mxu0 %v6367_v27  ;;  %4349 = vmatpush1.bf16.msra.mxu1 %v6370_v28 }
 0x3ce   : > { %4248 = vmatprep.subr.bf16.mxu0 %v6375_v52  ;;  %4350 = vmatprep.subr.bf16.mxu1 %v6378_v0 }
 0x3d1   : > { %4249 = vmatpush1.bf16.msra.mxu0 %v6373_v29  ;;  %4351 = vmatpush1.bf16.msra.mxu1 %v6376_v30 }
 0x3d2   : > { %4250 = vmatprep.subr.bf16.mxu0 %v6381_v31  ;;  %4352 = vmatprep.subr.bf16.mxu1 %v6384_v32 }
 0x3d5   : > { %4251 = vmatpush1.bf16.msra.mxu0 %v6379_v33  ;;  %4353 = vmatpush1.bf16.msra.mxu1 %v6382_v34 }
 0x3d6   : > { %4252 = vmatprep.subr.bf16.mxu0 %v6387_v35  ;;  %4354 = vmatprep.subr.bf16.mxu1 %v6390_v36 }
 0x3d9   : > { %4253 = vmatpush1.bf16.msra.mxu0 %v6385_v24  ;;  %4355 = vmatpush1.bf16.msra.mxu1 %v6388_v60 }
 0x3da   : > { %4254 = vmatprep.subr.bf16.mxu0 %v6393_v37  ;;  %4356 = vmatprep.subr.bf16.mxu1 %v6396_v38 }
 0x3dd   : > { %4255 = vmatpush1.bf16.msra.mxu0 %v6391_v40  ;;  %4357 = vmatpush1.bf16.msra.mxu1 %v6394_v41  ;;  %v6415_v40 = vld [vmem:[%s6937_s30 + $0xe00] ss:$16 sps:$4 sm:$0xff]  }
 0x3de   : > { %4256 = vmatprep.subr.bf16.mxu0 %v6399_v42  ;;  %4358 = vmatprep.subr.bf16.mxu1 %v6402_v43 }
 0x3e1   : > { %4257 = vmatpush1.bf16.msra.mxu0 %v6397_v1  ;;  %4359 = vmatpush1.bf16.msra.mxu1 %v6400_v4  ;;  %v6418_v4 = vld [vmem:[%s6937_s30 + $0xe08] ss:$16 sps:$4 sm:$0xff]  }
 0x3e2   : > { %4258 = vmatprep.subr.bf16.mxu0 %v6405_v44  ;;  %4360 = vmatprep.subr.bf16.mxu1 %v6408_v45  ;;  %v6423_v44 = vld [vmem:[%s6937_s30 + $0xe24] ss:$16 sps:$4 sm:$0xff]  }
 0x3e5   : > { %4259 = vmatpush1.bf16.msra.mxu0 %v6403_v46  ;;  %4361 = vmatpush1.bf16.msra.mxu1 %v6406_v47 }
 0x3e6   : > { %4260 = vmatprep.subr.bf16.mxu0 %v6411_v48  ;;  %4362 = vmatprep.subr.bf16.mxu1 %v6414_v49  ;;  %v6426_v49 = vld [vmem:[%s6937_s30 + $0xe2c] ss:$16 sps:$4 sm:$0xff]  }
 0x3e9   : > { %4261 = vmatpush1.bf16.msra.mxu0 %v6409_v50  ;;  %4363 = vmatpush1.bf16.msra.mxu1 %v6412_v51 }
 0x3ea   : > { %4281 = vmatprep.subr.bf16.mxu0 %v6417_v39  ;;  %4383 = vmatprep.subr.bf16.mxu1 %v6420_v14  ;;  %v6421_v39 = vld [vmem:[%s6937_s30 + $0xe20] ss:$16 sps:$4 sm:$0xff]   ;;  %v6424_v14 = vld [vmem:[%s6937_s30 + $0xe28] ss:$16 sps:$4 sm:$0xff]  }
 0x47e   : > { %v3287_v57 = vpop.f32.mrb[16].mxu0  ;;  %v3389_v58 = vpop.f32.mrb[16].mxu1 }
 0x47f   : > { %v5571_v59 = vadd.f32 %v3287_v57, %v2545_v54  ;;  %v5577_v61 = vadd.f32 %v3389_v58, %v7519_v55  ;;  %v3289_v62 = vpop.f32.mrb[17].mxu0  ;;  %v3391_v63 = vpop.f32.mrb[17].mxu1  ;;  %v6432_v57 = vld [vmem:[%s6937_s30 + $0xe4c] ss:$16 sps:$4 sm:$0xff]   ;;  %v6427_v58 = vld [vmem:[%s6937_s30 + $0xe40] ss:$16 sps:$4 sm:$0xff]  }
 0x480   : > { %v5572_v3 = vadd.f32 %v3289_v62, %v2549_v56  ;;  %v5578_v2 = vadd.f32 %v3391_v63, %v7523_v16  ;;  %v3291_v8 = vpop.f32.mrb[18].mxu0  ;;  %v3393_v7 = vpop.f32.mrb[18].mxu1  ;;  %v6435_v62 = vld [vmem:[%s6937_s30 + $0xe64] ss:$16 sps:$4 sm:$0xff]   ;;  %v6438_v63 = vld [vmem:[%s6937_s30 + $0xe6c] ss:$16 sps:$4 sm:$0xff]  }
 0x481   : > { %v3406_v17 = vmul.f32 0.2, %v5571_v59  ;;  %v3408_v5 = vmul.f32 0.2, %v5577_v61  ;;  %v5573_v9 = vadd.f32 %v3291_v8, %v2545_v54  ;;  %v5579_v6 = vadd.f32 %v3393_v7, %v7519_v55  ;;  %v3293_v10 = vpop.f32.mrb[19].mxu0  ;;  %v3395_v11 = vpop.f32.mrb[19].mxu1 }
 0x482   : > { %v3407_v12 = vmul.f32 0.2, %v5572_v3  ;;  %v3409_v13 = vmul.f32 0.2, %v5578_v2  ;;  %v5574_v15 = vadd.f32 %v3293_v10, %v2549_v56  ;;  %v5580_v18 = vadd.f32 %v3395_v11, %v7523_v16  ;;  %v6441_v8 = vld [vmem:[%s6937_s30 + $0xe84] ss:$16 sps:$4 sm:$0xff]  }
 0x483   : > { %v3410_v21 = vmul.f32 0.2, %v5573_v9  ;;  %v3412_v25 = vmul.f32 0.2, %v5579_v6  ;;  %v3418_v28 = vmax.f32 %v5571_v59, %v3406_v17  ;;  %v3420_v52 = vmax.f32 %v5577_v61, %v3408_v5  ;;  %v6430_v59 = vld [vmem:[%s6937_s30 + $0xe48] ss:$16 sps:$4 sm:$0xff]  }
 0x484   : > { %v3411_v26 = vmul.f32 0.2, %v5574_v15  ;;  %v3413_v27 = vmul.f32 0.2, %v5580_v18  ;;  %v3419_v30 = vmax.f32 %v5572_v3, %v3407_v12  ;;  %v3421_v31 = vmax.f32 %v5578_v2, %v3409_v13  ;;  %v6433_v3 = vld [vmem:[%s6937_s30 + $0xe60] ss:$16 sps:$4 sm:$0xff]  }
 0x485   : > { %v3422_v0 = vmax.f32 %v5573_v9, %v3410_v21  ;;  %v3424_v29 = vmax.f32 %v5579_v6, %v3412_v25  ;;  %v6436_v2 = vld [vmem:[%s6937_s30 + $0xe68] ss:$16 sps:$4 sm:$0xff]   ;;  %v6444_v7 = vld [vmem:[%s6937_s30 + $0xe8c] ss:$16 sps:$4 sm:$0xff]   ;;  %v6439_v17 = vld [vmem:[%s6937_s30 + $0xe80] ss:$16 sps:$4 sm:$0xff]  }
 0x486   : > { %v3423_v32 = vmax.f32 %v5574_v15, %v3411_v26  ;;  %v3425_v33 = vmax.f32 %v5580_v18, %v3413_v27  ;;  %v3297_v34 = vpop.f32.mrb[20].mxu0  ;;  %v7529_v35 = vpop.f32.mrb[20].mxu1  ;;  %v6442_v5 = vld [vmem:[%s6937_s30 + $0xe88] ss:$16 sps:$4 sm:$0xff]   ;;  %v6447_v9 = vld [vmem:[%s6937_s30 + $0xea4] ss:$16 sps:$4 sm:$0xff]  }
 0x487   : > { %v3559_v36 = vpack.c.bf16 %v3422_v0, %v3418_v28  ;;  %v7531_v24 = vpack.c.bf16 %v3424_v29, %v3420_v52  ;;  %v5575_v60 = vadd.f32 %v3297_v34, %v2545_v54  ;;  %v3299_v37 = vpop.f32.mrb[21].mxu0  ;;  %v7533_v38 = vpop.f32.mrb[21].mxu1  ;;  %v6450_v6 = vld [vmem:[%s6937_s30 + $0xeac] ss:$16 sps:$4 sm:$0xff]   ;;  %v6445_v10 = vld [vmem:[%s6937_s30 + $0xea0] ss:$16 sps:$4 sm:$0xff]  }
 0x488   : > { %v5576_v41 = vadd.f32 %v3299_v37, %v2549_v56  ;;  %v3301_v42 = vpop.f32.mrb[22].mxu0  ;;  %v3403_v43 = vpop.f32.mrb[22].mxu1  ;;  %v3560_v1 = vpack.c.bf16 %v3423_v32, %v3419_v30  ;;  %v3562_v45 = vpack.c.bf16 %v3425_v33, %v3421_v31  ;;  %v6429_v56 = vld [vmem:[%s6937_s30 + $0xe44] ss:$16 sps:$4 sm:$0xff]   ;;  %v6448_v11 = vld [vmem:[%s6937_s30 + $0xea8] ss:$16 sps:$4 sm:$0xff]  }
 0x489   : > { %v3414_v46 = vmul.f32 0.2, %v5575_v60  ;;  %v3302_v47 = vpop.f32.mrb[23].mxu0  ;;  %v3404_v48 = vpop.f32.mrb[23].mxu1  ;;  %v6453_v12 = vld [vmem:[%s6937_s30 + $0xec4] ss:$16 sps:$4 sm:$0xff]  }
 0x48a   : > { %v3415_v50 = vmul.f32 0.2, %v5576_v41  ;;  %4262 = vmatprep.mubr.bf16.mxu0 %v3560_v1  ;;  %4364 = vmatprep.mubr.bf16.mxu1 %v3560_v1  ;;  %v6456_v13 = vld [vmem:[%s6937_s30 + $0xecc] ss:$16 sps:$4 sm:$0xff]   ;;  %v6451_v15 = vld [vmem:[%s6937_s30 + $0xec0] ss:$16 sps:$4 sm:$0xff]  }
 0x48b   : > { %4263 = vmatmul.mubr.bf16.vlgmr.msra.gmra.mrb[24].mxu0 %v3559_v36  ;;  %4365 = vmatmul.mubr.bf16.vlgmr.msra.gmra.mrb[24].mxu1 %v3559_v36  ;;  %v3426_v53 = vmax.f32 %v5575_v60, %v3414_v46  ;;  %v6454_v18 = vld [vmem:[%s6937_s30 + $0xec8] ss:$16 sps:$4 sm:$0xff]   ;;  %v6459_v21 = vld [vmem:[%s6937_s30 + $0xee4] ss:$16 sps:$4 sm:$0xff]   ;;  %v6462_v25 = vld [vmem:[%s6937_s30 + $0xeec] ss:$16 sps:$4 sm:$0xff]  }
 0x48c   : > { %v3427_v51 = vmax.f32 %v5576_v41, %v3415_v50  ;;  %4282 = vmatpush1.bf16.msra.mxu0 %v6415_v40  ;;  %4384 = vmatpush1.bf16.msra.mxu1 %v6418_v4  ;;  %v6457_v26 = vld [vmem:[%s6937_s30 + $0xee0] ss:$16 sps:$4 sm:$0xff]   ;;  %v6460_v27 = vld [vmem:[%s6937_s30 + $0xee8] ss:$16 sps:$4 sm:$0xff]   ;;  %v6465_v28 = vld [vmem:[%s6937_s30 + $0xf04] ss:$16 sps:$4 sm:$0xff]  }
 0x48d   : > { %4283 = vmatprep.subr.bf16.mxu0 %v6423_v44  ;;  %4385 = vmatprep.subr.bf16.mxu1 %v6426_v49  ;;  %v3563_v61 = vpack.c.bf16 %v3426_v53, %v3426_v53  ;;  %v6468_v52 = vld [vmem:[%s6937_s30 + $0xf0c] ss:$16 sps:$4 sm:$0xff]   ;;  %v6463_v0 = vld [vmem:[%s6937_s30 + $0xf00] ss:$16 sps:$4 sm:$0xff]   ;;  %v6466_v29 = vld [vmem:[%s6937_s30 + $0xf08] ss:$16 sps:$4 sm:$0xff]  }
 0x48e   : > { %v3564_v54 = vpack.c.bf16 %v3427_v51, %v3427_v51  ;;  %v6471_v30 = vld [vmem:[%s6937_s30 + $0xf24] ss:$16 sps:$4 sm:$0xff]   ;;  %v6474_v31 = vld [vmem:[%s6937_s30 + $0xf2c] ss:$16 sps:$4 sm:$0xff]   ;;  %v6469_v32 = vld [vmem:[%s6937_s30 + $0xf20] ss:$16 sps:$4 sm:$0xff]  }
 0x48f   : > { %v6472_v33 = vld [vmem:[%s6937_s30 + $0xf28] ss:$16 sps:$4 sm:$0xff]   ;;  %v6477_v34 = vld [vmem:[%s6937_s30 + $0xf44] ss:$16 sps:$4 sm:$0xff]   ;;  %v6480_v36 = vld [vmem:[%s6937_s30 + $0xf4c] ss:$16 sps:$4 sm:$0xff]  }
 0x490   : > { %4284 = vmatpush1.bf16.msra.mxu0 %v6421_v39  ;;  %4386 = vmatpush1.bf16.msra.mxu1 %v6424_v14  ;;  %v6475_v60 = vld [vmem:[%s6937_s30 + $0xf40] ss:$16 sps:$4 sm:$0xff]   ;;  %v6478_v37 = vld [vmem:[%s6937_s30 + $0xf48] ss:$16 sps:$4 sm:$0xff]   ;;  %v6483_v40 = vld [vmem:[%s6937_s30 + $0xf64] ss:$16 sps:$4 sm:$0xff]   ;;  %v5582_v39 = vadd.f32 %v7533_v38, %v7523_v16 }
 0x491   : > { %4272 = vmatprep.mubr.bf16.mxu0 %v3564_v54  ;;  %4374 = vmatprep.mubr.bf16.mxu1 %v3564_v54  ;;  %v6486_v41 = vld [vmem:[%s6937_s30 + $0xf6c] ss:$16 sps:$4 sm:$0xff]   ;;  %v6481_v42 = vld [vmem:[%s6937_s30 + $0xf60] ss:$16 sps:$4 sm:$0xff]   ;;  %v6484_v43 = vld [vmem:[%s6937_s30 + $0xf68] ss:$16 sps:$4 sm:$0xff]  }
 0x492   : > { %4285 = vmatprep.subr.bf16.mxu0 %v6429_v56  ;;  %4387 = vmatprep.subr.bf16.mxu1 %v6432_v57  ;;  %v6489_v1 = vld [vmem:[%s6937_s30 + $0xf84] ss:$16 sps:$4 sm:$0xff]   ;;  %v6492_v4 = vld [vmem:[%s6937_s30 + $0xf8c] ss:$16 sps:$4 sm:$0xff]   ;;  %v6487_v44 = vld [vmem:[%s6937_s30 + $0xf80] ss:$16 sps:$4 sm:$0xff]  }
 0x493   : > { %4273 = vmatmul.mubr.bf16.gmra.mrb[28].mxu0 %v3563_v61  ;;  %4375 = vmatmul.mubr.bf16.gmra.mrb[28].mxu1 %v3563_v61  ;;  %v6495_v46 = vld [vmem:[%s6937_s30 + $0xfa4] ss:$16 sps:$4 sm:$0xff]   ;;  %v6498_v47 = vld [vmem:[%s6937_s30 + $0xfac] ss:$16 sps:$4 sm:$0xff]   ;;  %v6493_v48 = vld [vmem:[%s6937_s30 + $0xfa0] ss:$16 sps:$4 sm:$0xff]   ;;  %v5581_v61 = vadd.f32 %v7529_v35, %v7519_v55 }
 0x494   : > { %4286 = vmatpush1.bf16.msra.mxu0 %v6427_v58  ;;  %4388 = vmatpush1.bf16.msra.mxu1 %v6430_v59  ;;  %v6496_v49 = vld [vmem:[%s6937_s30 + $0xfa8] ss:$16 sps:$4 sm:$0xff]   ;;  %v6501_v50 = vld [vmem:[%s6937_s30 + $0xfc4] ss:$16 sps:$4 sm:$0xff]   ;;  %v6504_v51 = vld [vmem:[%s6937_s30 + $0xfcc] ss:$16 sps:$4 sm:$0xff]  }
 0x495   : > { %4313 = vmatprep.mubr.bf16.mxu0 %v3562_v45  ;;  %4415 = vmatprep.mubr.bf16.mxu1 %v3562_v45  ;;  %v6490_v45 = vld [vmem:[%s6937_s30 + $0xf88] ss:$16 sps:$4 sm:$0xff]   ;;  %v6499_v14 = vld [vmem:[%s6937_s30 + $0xfc0] ss:$16 sps:$4 sm:$0xff]   ;;  %v6507_v54 = vld [vmem:[%s6937_s30 + $0xfe4] ss:$16 sps:$4 sm:$0xff]  }
 0x496   : > { %4287 = vmatprep.subr.bf16.mxu0 %v6435_v62  ;;  %4389 = vmatprep.subr.bf16.mxu1 %v6438_v63  ;;  %v6502_v53 = vld [vmem:[%s6937_s30 + $0xfc8] ss:$16 sps:$4 sm:$0xff]   ;;  %v6510_v56 = vld [vmem:[%s6937_s30 + $0xfec] ss:$16 sps:$4 sm:$0xff]   ;;  %v3417_v57 = vmul.f32 0.2, %v5582_v39 }
 0x497   : > { %v6505_v58 = vld [vmem:[%s6937_s30 + $0xfe0] ss:$16 sps:$4 sm:$0xff]   ;;  %v6508_v59 = vld [vmem:[%s6937_s30 + $0xfe8] ss:$16 sps:$4 sm:$0xff]   ;;  %v3416_v38 = vmul.f32 0.2, %v5581_v61 }
 0x498   : > { %4288 = vmatpush1.bf16.msra.mxu0 %v6433_v3  ;;  %4390 = vmatpush1.bf16.msra.mxu1 %v6436_v2  ;;  %v3429_v16 = vmax.f32 %v5582_v39, %v3417_v57  ;;  %v5413_v2 = vld [vmem:[%s7204_s24 + $0xc] sm:$0xf] }
 0x499   : > { %4289 = vmatprep.subr.bf16.mxu0 %v6441_v8  ;;  %4391 = vmatprep.subr.bf16.mxu1 %v6444_v7  ;;  %v3428_v63 = vmax.f32 %v5581_v61, %v3416_v38  ;;  %v3573_v55 = vrot.slane %v5413_v2, %v7200_v19  ;;  %v3581_v35 = vrot.slane %v5413_v2, %v7202_v20 }
 0x49a   : > { %v3566_v62 = vpack.c.bf16 %v3429_v16, %v3429_v16  ;;  %v3577_v8 = vrot.slane %v5413_v2, %v7207_v22  ;;  %v3585_v7 = vrot.slane %v5413_v2, %v7209_v23 }
 0x49b   : > { %v3565_v3 = vpack.c.bf16 %v3428_v63, %v3428_v63 }
 0x49c   : > { %4290 = vmatpush1.bf16.msra.mxu0 %v6439_v17  ;;  %4392 = vmatpush1.bf16.msra.mxu1 %v6442_v5 }
 0x49d   : > { %4291 = vmatprep.subr.bf16.mxu0 %v6447_v9  ;;  %4393 = vmatprep.subr.bf16.mxu1 %v6450_v6 }
 0x4a0   : > { %4292 = vmatpush1.bf16.msra.mxu0 %v6445_v10  ;;  %4394 = vmatpush1.bf16.msra.mxu1 %v6448_v11 }
 0x4a1   : > { %4293 = vmatprep.subr.bf16.mxu0 %v6453_v12  ;;  %4395 = vmatprep.subr.bf16.mxu1 %v6456_v13 }
 0x4a4   : > { %4294 = vmatpush1.bf16.msra.mxu0 %v6451_v15  ;;  %4396 = vmatpush1.bf16.msra.mxu1 %v6454_v18 }
 0x4a5   : > { %4295 = vmatprep.subr.bf16.mxu0 %v6459_v21  ;;  %4397 = vmatprep.subr.bf16.mxu1 %v6462_v25 }
 0x4a8   : > { %4296 = vmatpush1.bf16.msra.mxu0 %v6457_v26  ;;  %4398 = vmatpush1.bf16.msra.mxu1 %v6460_v27 }
 0x4a9   : > { %4297 = vmatprep.subr.bf16.mxu0 %v6465_v28  ;;  %4399 = vmatprep.subr.bf16.mxu1 %v6468_v52 }
 0x4ac   : > { %4298 = vmatpush1.bf16.msra.mxu0 %v6463_v0  ;;  %4400 = vmatpush1.bf16.msra.mxu1 %v6466_v29 }
 0x4ad   : > { %4299 = vmatprep.subr.bf16.mxu0 %v6471_v30  ;;  %4401 = vmatprep.subr.bf16.mxu1 %v6474_v31 }
 0x4b0   : > { %4300 = vmatpush1.bf16.msra.mxu0 %v6469_v32  ;;  %4402 = vmatpush1.bf16.msra.mxu1 %v6472_v33 }
 0x4b1   : > { %4301 = vmatprep.subr.bf16.mxu0 %v6477_v34  ;;  %4403 = vmatprep.subr.bf16.mxu1 %v6480_v36 }
 0x4b4   : > { %4302 = vmatpush1.bf16.msra.mxu0 %v6475_v60  ;;  %4404 = vmatpush1.bf16.msra.mxu1 %v6478_v37 }
 0x4b5   : > { %4303 = vmatprep.subr.bf16.mxu0 %v6483_v40  ;;  %4405 = vmatprep.subr.bf16.mxu1 %v6486_v41 }
 0x4b8   : > { %4304 = vmatpush1.bf16.msra.mxu0 %v6481_v42  ;;  %4406 = vmatpush1.bf16.msra.mxu1 %v6484_v43 }
 0x4b9   : > { %4305 = vmatprep.subr.bf16.mxu0 %v6489_v1  ;;  %4407 = vmatprep.subr.bf16.mxu1 %v6492_v4 }
 0x4bc   : > { %4306 = vmatpush1.bf16.msra.mxu0 %v6487_v44  ;;  %4408 = vmatpush1.bf16.msra.mxu1 %v6490_v45 }
 0x4bd   : > { %4307 = vmatprep.subr.bf16.mxu0 %v6495_v46  ;;  %4409 = vmatprep.subr.bf16.mxu1 %v6498_v47 }
 0x4c0   : > { %4308 = vmatpush1.bf16.msra.mxu0 %v6493_v48  ;;  %4410 = vmatpush1.bf16.msra.mxu1 %v6496_v49 }
 0x4c1   : > { %4309 = vmatprep.subr.bf16.mxu0 %v6501_v50  ;;  %4411 = vmatprep.subr.bf16.mxu1 %v6504_v51 }
 0x4c4   : > { %4310 = vmatpush1.bf16.msra.mxu0 %v6499_v14  ;;  %4412 = vmatpush1.bf16.msra.mxu1 %v6502_v53 }
 0x4c5   : > { %4311 = vmatprep.subr.bf16.mxu0 %v6507_v54  ;;  %4413 = vmatprep.subr.bf16.mxu1 %v6510_v56 }
 0x4c8   : > { %4312 = vmatpush1.bf16.msra.mxu0 %v6505_v58  ;;  %4414 = vmatpush1.bf16.msra.mxu1 %v6508_v59 }
 0x4cb   : > { %4314 = vmatmul.mubr.bf16.vlgmr.msra.gmra.mrb[24].mxu0 %v7531_v24  ;;  %4416 = vmatmul.mubr.bf16.vlgmr.msra.gmra.mrb[24].mxu1 %v7531_v24 }
 0x4cc   : > { %4323 = vmatprep.mubr.bf16.mxu0 %v3566_v62  ;;  %4425 = vmatprep.mubr.bf16.mxu1 %v3566_v62 }
 0x4d3   : > { %4324 = vmatmul.mubr.bf16.gmra.mrb[28].mxu0 %v3565_v3  ;;  %4426 = vmatmul.mubr.bf16.gmra.mrb[28].mxu1 %v3565_v3 }
 0x59e   : > { %v4315_v17 = vpop.f32.mrb[24].mxu0  ;;  %v4417_v5 = vpop.f32.mrb[24].mxu1 }
 0x59f   : > { %v5583_v9 = vadd.f32 %v4315_v17, %v3573_v55  ;;  %v5589_v6 = vadd.f32 %v4417_v5, %v3581_v35  ;;  %v4317_v24 = vpop.f32.mrb[25].mxu0  ;;  %v4419_v10 = vpop.f32.mrb[25].mxu1 }
 0x5a0   : > { %v5584_v11 = vadd.f32 %v4317_v24, %v3577_v8  ;;  %v5590_v12 = vadd.f32 %v4419_v10, %v3585_v7  ;;  %v4319_v13 = vpop.f32.mrb[26].mxu0  ;;  %v4421_v15 = vpop.f32.mrb[26].mxu1 }
 0x5a1   : > { %v4434_v18 = vmul.f32 0.2, %v5583_v9  ;;  %v4436_v21 = vmul.f32 0.2, %v5589_v6  ;;  %v5585_v25 = vadd.f32 %v4319_v13, %v3573_v55  ;;  %v5591_v19 = vadd.f32 %v4421_v15, %v3581_v35  ;;  %v4321_v26 = vpop.f32.mrb[27].mxu0  ;;  %v4423_v20 = vpop.f32.mrb[27].mxu1 }
 0x5a2   : > { %v4435_v27 = vmul.f32 0.2, %v5584_v11  ;;  %v4437_v22 = vmul.f32 0.2, %v5590_v12  ;;  %v5586_v23 = vadd.f32 %v4321_v26, %v3577_v8  ;;  %v5592_v28 = vadd.f32 %v4423_v20, %v3585_v7 }
 0x5a3   : > { %v4446_v52 = vmax.f32 %v5583_v9, %v4434_v18  ;;  %v4448_v0 = vmax.f32 %v5589_v6, %v4436_v21  ;;  %v4438_v29 = vmul.f32 0.2, %v5585_v25  ;;  %v4440_v30 = vmul.f32 0.2, %v5591_v19 }
 0x5a4   : > { %v4447_v31 = vmax.f32 %v5584_v11, %v4435_v27  ;;  %v4449_v32 = vmax.f32 %v5590_v12, %v4437_v22  ;;  %v4439_v33 = vmul.f32 0.2, %v5586_v23  ;;  %v4441_v34 = vmul.f32 0.2, %v5592_v28 }
 0x5a5   : > { %v4458_v36 = vmul.f32 1.4142135, %v4446_v52  ;;  %v4460_v60 = vmul.f32 1.4142135, %v4448_v0  ;;  %v4450_v37 = vmax.f32 %v5585_v25, %v4438_v29  ;;  %v4452_v40 = vmax.f32 %v5591_v19, %v4440_v30 }
 0x5a6   : > { %v4459_v41 = vmul.f32 1.4142135, %v4447_v31  ;;  %v4461_v42 = vmul.f32 1.4142135, %v4449_v32  ;;  %v4451_v43 = vmax.f32 %v5586_v23, %v4439_v33  ;;  %v4453_v1 = vmax.f32 %v5592_v28, %v4441_v34  ;;  %v4325_v4 = vpop.f32.mrb[28].mxu0  ;;  %v4427_v44 = vpop.f32.mrb[28].mxu1 }
 0x5a7   : > { %4470 = vst [vmem:[%s7611_s8] sm:$0xff] %v4458_v36  ;;  %4472 = vst [vmem:[%s7611_s8 + $0x10] sm:$0xff] %v4460_v60  ;;  %v4462_v45 = vmul.f32 1.4142135, %v4450_v37  ;;  %v4464_v46 = vmul.f32 1.4142135, %v4452_v40  ;;  %v5587_v47 = vadd.f32 %v4325_v4, %v3573_v55  ;;  %v5593_v48 = vadd.f32 %v4427_v44, %v3581_v35  ;;  %v4327_v49 = vpop.f32.mrb[29].mxu0 }
 0x5a8   : > { %v4429_v50 = vpop.f32.mrb[29].mxu1  ;;  %4471 = vst [vmem:[%s7611_s8 + $0x8] sm:$0xff] %v4459_v41  ;;  %4473 = vst [vmem:[%s7611_s8 + $0x18] sm:$0xff] %v4461_v42  ;;  %v4463_v51 = vmul.f32 1.4142135, %v4451_v43  ;;  %v5588_v14 = vadd.f32 %v4327_v49, %v3577_v8  ;;  %v4329_v54 = vpop.f32.mrb[30].mxu0 }
 0x5a9   : > { %v4465_v39 = vmul.f32 1.4142135, %v4453_v1  ;;  %v5594_v53 = vadd.f32 %v4429_v50, %v3585_v7  ;;  %v4431_v56 = vpop.f32.mrb[30].mxu1  ;;  %4474 = vst [vmem:[%s7611_s8 + $0x20] sm:$0xff] %v4462_v45  ;;  %4476 = vst [vmem:[%s7611_s8 + $0x30] sm:$0xff] %v4464_v46  ;;  %v4330_v59 = vpop.f32.mrb[31].mxu0 }
 0x5aa   : > { %v4442_v57 = vmul.f32 0.2, %v5587_v47  ;;  %v4444_v58 = vmul.f32 0.2, %v5593_v48  ;;  %v4432_v61 = vpop.f32.mrb[31].mxu1  ;;  %4475 = vst [vmem:[%s7611_s8 + $0x28] sm:$0xff] %v4463_v51 }
 0x5ab   : > { %4477 = vst [vmem:[%s7611_s8 + $0x38] sm:$0xff] %v4465_v39  ;;  %v4443_v16 = vmul.f32 0.2, %v5588_v14  ;;  %v4445_v38 = vmul.f32 0.2, %v5594_v53 }
 0x5ac   : > { %v4454_v62 = vmax.f32 %v5587_v47, %v4442_v57  ;;  %v4456_v63 = vmax.f32 %v5593_v48, %v4444_v58 }
 0x5ad   : > { %v4455_v3 = vmax.f32 %v5588_v14, %v4443_v16  ;;  %v4457_v2 = vmax.f32 %v5594_v53, %v4445_v38 }
 0x5ae   : > { %v4466_v55 = vmul.f32 1.4142135, %v4454_v62  ;;  %v4468_v35 = vmul.f32 1.4142135, %v4456_v63 }
 0x5af   : > { %v4467_v8 = vmul.f32 1.4142135, %v4455_v3  ;;  %v4469_v7 = vmul.f32 1.4142135, %v4457_v2 }
 0x5b0   : > { %4478 = vst [vmem:[%s7611_s8 + $0x40] sm:$0xff] %v4466_v55  ;;  %4480 = vst [vmem:[%s7611_s8 + $0x50] sm:$0xff] %v4468_v35 }
 0x5b1   : > { %4479 = vst [vmem:[%s7611_s8 + $0x48] sm:$0xff] %v4467_v8  ;;  %4481 = vst [vmem:[%s7611_s8 + $0x58] sm:$0xff] %v4469_v7 }
 0x5b2   : > { %6625 = shalt.err (!%p6622_p12)
}
 0x5b3   : > { %s6626_s23 = scalar_lea.hbm %s7627_s6, 1536  ;;  %s6630_s0 = scalar_lea.hbm %s7684_s3, 4608 }
 0x5b4   : > { %p6627_p8 = scmp.ne.s32.totalorder %s7627_s6, %s6626_s23  ;;  %p6631_p4 = scmp.lt.u32.totalorder %s7627_s6, %s7684_s3 }
 0x5b5   : > { %p6632_p1 = scmp.lt.u32.totalorder %s6630_s0, %s6626_s23  ;;  %p6634_p13 = scmp.lt.u32.totalorder %s6626_s23, %s7627_s6 }
 0x5b6   : > { %p6628_p7 = pnand %p6627_p8, %p7703_p5 }
 0x5b7   : > { %p6633_p0 = por %p6632_p1, %p6631_p4 }
 0x5b8   : > { %p6629_p2 = pneg %p6628_p7 }
 0x5b9   : > { %p6635_p3 = por %p6634_p13, %p6633_p0 }
 0x5bb   : > { %p6636_p6 = pnand %p6635_p3, %p6629_p2 }
 0x5bd   : > { %6639 = shalt.err (!%p6636_p6)
}
 0x5be   : > { %s6710_s30 = smov 512   ;;  %s6711_s18 = smov 32  }
 0x5bf   : > { %5669 = dma.vmem_to_hbm [thread:$0]  (%p7703_p5), %s7629_s10, 1536, %s7627_s6, %s4483_s9, %s6710_s30, %s6710_s30, %s6711_s18  }
 0x5c0 PF: > { %p5686_p9 = scmp.ge.s32.totalorder %s6698_s17, 2  ;;  %s4514_s24 = sand.u32 1, %s6678_s12  }
 0x5c1   : > { %p7704_p11 = scmp.ne.s32.totalorder %s7694_s27, 0  ;;  %s4515_s29 = scalar_lea.sflag [#allocation4], %s4514_s24 }
 0x5c3   : > { %p5682_p10 = pnand %p5686_p9, %p7704_p11 }
 0x5c5   : > { %6673 = dma.done.wait (!%p5682_p10), %s4515_s29, 1536  }
 0x5c6   : > { %6675 = vsyncadd (!%p5682_p10), %s4515_s29, 4294965760  ;;  %s22_s17 = sadd.s32 1, %s6698_s17   ;;  %s7705_s25 = sld [smem:[#allocation12_spill]] }
 0x5c7   : > { %p19_p12 = scmp.ge.s32.totalorder %s22_s17, 5   ;;  %s7706_s12 = smov %s6682_s13 }
 0x5c8   : > { %s7707_s13 = smov %s6686_s14  ;;  %s7708_s14 = smov %s6792_s26 }
 0x5c9   : > { %s7709_s15 = smov %s6694_s16  ;;  %21 = sbr.rel (!%p19_p12) target bundleno = 11 (0xb), region = 107 }
 0x5cc   : > { %s7710_s16 = smov %s7705_s25 }
 0x5d0   :  { %4520 = vsyncpa [#allocation3], 1 }
 0x5d1   :  { %4522 = vsyncpa [#allocation3 + $0x1], 1 }
 0x5d2   :  { %4523 = vsyncpa [#allocation6], 1 }
 0x5d3   :  { %4525 = vsyncpa [#allocation6 + $0x1], 1 }
 0x5d4   :  { %4526 = vsyncpa [#allocation4], 1 }
 0x5d5   :  { %4528 = vsyncpa [#allocation4 + $0x1], 1 }

</bundles_post_ra>
